<compile_context>
chip_gen: v6e
topology: v6e:2x2x1
jax: 0.10.0
libtpu: 0.0.40
codegen_flags: <defaults>
</compile_context>

<pallas_src>
import jax
import jax.numpy as jnp
from jax import lax
from jax.experimental import pallas as pl
from jax.experimental.pallas import tpu as pltpu

# ----- small synthetic CLIP text-encoder config -----
VOCAB = 64
SEQ = 8              # n_ctx
D_MODEL = 32
N_HEADS = 4
HEAD_DIM = D_MODEL // N_HEADS
MLP_DIM = 4 * D_MODEL
N_LAYERS = 2
EMBED_DIM = 32       # text_projection output dim
LN_EPS = 1e-5
OUT_PAD = 128        # lane-dense output width (>= EMBED_DIM, multiple of 128)
OUT_ROWS = 8         # sublane-padded output rows per sequence (row 0 holds the EOT embedding)


def _layer_norm(x, g, b):
    mu = jnp.mean(x, axis=-1, keepdims=True)
    var = jnp.mean((x - mu) ** 2, axis=-1, keepdims=True)
    return (x - mu) * lax.rsqrt(var + LN_EPS) * g + b


# ---------------- Pallas kernel: one (sequence, layer) grid step ----------------
def clip_text_kernel(tokens_ref, eot_ref,                       # scalar prefetch (SMEM)
                     tok_emb_ref, pos_emb_ref,                  # resident fp32
                     wqkv_ref, wo_ref, w1_ref, w2_ref,          # per-layer bf16 (streamed)
                     vec_ref, b1_ref,                           # per-layer fp32 bias/LN slabs
                     lnf_ref, proj_ref,                         # resident fp32
                     o_ref, x_scratch):
    b = pl.program_id(0)                 # sequence index  (parallel)
    l = pl.program_id(1)                 # layer index     (arbitrary, weights streamed)

    # ---- l == 0: fused token-embedding gather + positional add ----
    @pl.when(l == 0)
    def _embed():
        for s in range(SEQ):
            tid = tokens_ref[b, s]
            x_scratch[pl.ds(s, 1), :] = (
                tok_emb_ref[pl.ds(tid, 1), :] + pos_emb_ref[pl.ds(s, 1), :])

    # packed per-layer bias / LN rows (fp32)
    vec = vec_ref[0]                                   # (9, D)
    ln1_g, ln1_b = vec[0:1], vec[1:2]
    bq, bk, bv, bo = vec[2:3], vec[3:4], vec[4:5], vec[5:6]
    ln2_g, ln2_b, b2 = vec[6:7], vec[7:8], vec[8:9]
    b1 = b1_ref[0]                                     # (1, MLP)

    x = x_scratch[...]                                 # (SEQ, D) fp32 residual stream

    # ---- pre-LN causal multi-head self-attention ----
    h = _layer_norm(x, ln1_g, ln1_b)
    qkv = jnp.dot(h.astype(jnp.bfloat16), wqkv_ref[0],
                  preferred_element_type=jnp.float32)  # (SEQ, 3D) fp32
    scale = 1.0 / (HEAD_DIM ** 0.5)
    q = (qkv[:, 0:D_MODEL] + bq) * scale
    k = qkv[:, D_MODEL:2 * D_MODEL] + bk
    v = qkv[:, 2 * D_MODEL:3 * D_MODEL] + bv

    # (SEQ, SEQ) causal mask — per sequence only (no (B*SEQ)^2 block-diagonal mask)
    row = lax.broadcasted_iota(jnp.int32, (SEQ, SEQ), 0)
    col = lax.broadcasted_iota(jnp.int32, (SEQ, SEQ), 1)
    mask_bias = jnp.where(col <= row, 0.0, -1e30).astype(jnp.float32)

    heads = []
    for hh in range(N_HEADS):                          # static lane slices, plain 2D MXU dots
        sl = slice(hh * HEAD_DIM, (hh + 1) * HEAD_DIM)
        qh, kh, vh = q[:, sl], k[:, sl], v[:, sl]
        s = lax.dot_general(qh, kh, (((1,), (1,)), ((), ())),
                            preferred_element_type=jnp.float32)   # (SEQ, SEQ)
        s = s + mask_bias
        s = s - jnp.max(s, axis=-1, keepdims=True)
        p = jnp.exp(s)
        p = p / jnp.sum(p, axis=-1, keepdims=True)     # exact fp32 softmax normalization
        heads.append(jnp.dot(p, vh, preferred_element_type=jnp.float32))  # (SEQ, HEAD_DIM)
    attn = jnp.concatenate(heads, axis=-1)             # (SEQ, D)
    x = x + jnp.dot(attn.astype(jnp.bfloat16), wo_ref[0],
                    preferred_element_type=jnp.float32) + bo

    # ---- pre-LN MLP with QuickGELU ----
    h = _layer_norm(x, ln2_g, ln2_b)
    h = jnp.dot(h.astype(jnp.bfloat16), w1_ref[0],
                preferred_element_type=jnp.float32) + b1
    h = h * jax.nn.sigmoid(1.702 * h)                  # QuickGELU (fp32 VPU/EUP)
    x = x + jnp.dot(h.astype(jnp.bfloat16), w2_ref[0],
                    preferred_element_type=jnp.float32) + b2
    x_scratch[...] = x

    # ---- last layer: ln_final + text projection of the EOT row only ----
    @pl.when(l == N_LAYERS - 1)
    def _final():
        eot = eot_ref[b]
        row_x = x_scratch[pl.ds(eot, 1), :]            # (1, D)
        lnf = lnf_ref[...]
        row_x = _layer_norm(row_x, lnf[0:1], lnf[1:2])
        out = jnp.dot(row_x, proj_ref[...],
                      preferred_element_type=jnp.float32)         # (1, OUT_PAD)
        o_ref[...] = jnp.broadcast_to(out, (OUT_ROWS, OUT_PAD))   # lane-dense unmasked store


def clip_text_forward(packed, text, eot_idx):
    B = text.shape[0]

    def layer_spec(shape):               # per-layer streamed weight slab
        nd = len(shape)
        return pl.BlockSpec((1,) + shape, lambda b, l, *_: (l,) + (0,) * nd)

    def resident_spec(arr):               # small VMEM-resident parameter
        nd = arr.ndim
        return pl.BlockSpec(arr.shape, lambda b, l, *_: (0,) * nd)

    grid_spec = pltpu.PrefetchScalarGridSpec(
        num_scalar_prefetch=2,             # token ids, eot indices -> SMEM
        grid=(B, N_LAYERS),
        in_specs=[
            resident_spec(packed["tok_emb"]),
            resident_spec(packed["pos_emb"]),
            layer_spec((D_MODEL, 3 * D_MODEL)),
            layer_spec((D_MODEL, D_MODEL)),
            layer_spec((D_MODEL, MLP_DIM)),
            layer_spec((MLP_DIM, D_MODEL)),
            layer_spec((9, D_MODEL)),
            layer_spec((1, MLP_DIM)),
            resident_spec(packed["lnf"]),
            resident_spec(packed["proj_pad"]),
        ],
        out_specs=pl.BlockSpec((OUT_ROWS, OUT_PAD), lambda b, l, *_: (b, 0)),
        scratch_shapes=[pltpu.VMEM((SEQ, D_MODEL), jnp.float32)],  # residual stream carry
    )
    return pl.pallas_call(
        clip_text_kernel,
        out_shape=jax.ShapeDtypeStruct((B * OUT_ROWS, OUT_PAD), jnp.float32),
        grid_spec=grid_spec,
        compiler_params=pltpu.CompilerParams(
            dimension_semantics=("parallel", "arbitrary"),   # batch megacore-shardable (v7x)
            vmem_limit_bytes=32 * 1024 * 1024),
    )(text, eot_idx,
      packed["tok_emb"], packed["pos_emb"],
      packed["wqkv"], packed["wo"], packed["w1"], packed["w2"],
      packed["vec"], packed["b1"], packed["lnf"], packed["proj_pad"])


# ---------------- parameter init (deterministic, fp32 — matches convert_to_fp32) ----------------
def init_params(key):
    def normal(k, shape, scale=0.02):
        return (scale * jax.random.normal(k, shape)).astype(jnp.float32)

    keys = jax.random.split(key, 3 + N_LAYERS)
    layers = []
    for l in range(N_LAYERS):
        k = jax.random.split(keys[3 + l], 4)
        layers.append({
            "ln1_g": jnp.ones((1, D_MODEL), jnp.float32),
            "ln1_b": jnp.zeros((1, D_MODEL), jnp.float32),
            "wqkv": normal(k[0], (D_MODEL, 3 * D_MODEL)),
            "bqkv": jnp.zeros((3 * D_MODEL,), jnp.float32),
            "wo": normal(k[1], (D_MODEL, D_MODEL)),
            "bo": jnp.zeros((1, D_MODEL), jnp.float32),
            "ln2_g": jnp.ones((1, D_MODEL), jnp.float32),
            "ln2_b": jnp.zeros((1, D_MODEL), jnp.float32),
            "w1": normal(k[2], (D_MODEL, MLP_DIM)),
            "b1": jnp.zeros((1, MLP_DIM), jnp.float32),
            "w2": normal(k[3], (MLP_DIM, D_MODEL)),
            "b2": jnp.zeros((1, D_MODEL), jnp.float32),
        })
    return {
        "tok_emb": normal(keys[0], (VOCAB, D_MODEL)),
        "pos_emb": normal(keys[1], (SEQ, D_MODEL), 0.01),
        "lnf_g": jnp.ones((1, D_MODEL), jnp.float32),
        "lnf_b": jnp.zeros((1, D_MODEL), jnp.float32),
        "proj": normal(keys[2], (D_MODEL, EMBED_DIM)),
        "layers": layers,
    }


def pack_params(params):
    layers = params["layers"]

    def stack_bf16(name):   # bulk matmul weights -> bf16: halves DMA, 2x MXU on v6e/v7x
        return jnp.stack([lp[name] for lp in layers], axis=0).astype(jnp.bfloat16)

    vec_rows = []
    for lp in layers:
        bqkv = lp["bqkv"].reshape(3, D_MODEL)            # rows: bq, bk, bv
        vec_rows.append(jnp.concatenate(
            [lp["ln1_g"], lp["ln1_b"], bqkv, lp["bo"],
             lp["ln2_g"], lp["ln2_b"], lp["b2"]], axis=0))  # (9, D) fp32

    # projection padded to 128 output lanes -> lane-dense unmasked stores in the kernel
    proj_pad = jnp.zeros((D_MODEL, OUT_PAD), jnp.float32).at[:, :EMBED_DIM].set(params["proj"])

    return {
        "tok_emb": params["tok_emb"],                    # (V, D) fp32
        "pos_emb": params["pos_emb"],                    # (SEQ, D) fp32
        "wqkv": stack_bf16("wqkv"),                      # (L, D, 3D) bf16
        "wo": stack_bf16("wo"),                          # (L, D, D)  bf16
        "w1": stack_bf16("w1"),                          # (L, D, MLP) bf16
        "w2": stack_bf16("w2"),                          # (L, MLP, D) bf16
        "vec": jnp.stack(vec_rows, axis=0),              # (L, 9, D) fp32
        "b1": jnp.stack([lp["b1"] for lp in layers], 0), # (L, 1, MLP) fp32
        "lnf": jnp.concatenate([params["lnf_g"], params["lnf_b"]], axis=0),  # (2, D) fp32
        "proj_pad": proj_pad,                            # (D, OUT_PAD) fp32
    }


@jax.jit
def encode_text(packed, text):
    B = text.shape[0]
    text = text.astype(jnp.int32)
    # EOT row = argmax of token ids (matches the real CLIP tokenizer where EOT has the
    # highest id; with synthetic random tokens it simply picks the max-id position).
    eot_idx = jnp.argmax(text, axis=-1).astype(jnp.int32)
    out = clip_text_forward(packed, text, eot_idx)       # (B*OUT_ROWS, OUT_PAD)
    return out.reshape(B, OUT_ROWS, OUT_PAD)[:, 0, :EMBED_DIM]


if __name__ == "__main__":
    key = jax.random.PRNGKey(0)
    pkey, tkey = jax.random.split(key)
    packed = pack_params(init_params(pkey))
    batch = 2
    text = jax.random.randint(tkey, (batch, SEQ), 0, VOCAB, dtype=jnp.int32)

    out = encode_text(packed, text)
    jax.block_until_ready(out)
    assert out.shape == (batch, EMBED_DIM) and out.dtype == jnp.float32
    assert bool(jnp.all(jnp.isfinite(out)))
    print("KERNEL_OK")
</pallas_src>

<mosaic_0001>
module attributes {stable_mosaic.version = 11 : i64} {
  func.func @clip_text_kernel(%arg0: i32, %arg1: i32, %arg2: memref<2x8xi32, #tpu.memory_space<smem>>, %arg3: memref<2xi32, #tpu.memory_space<smem>>, %arg4: memref<64x32xf32, #tpu.memory_space<vmem>>, %arg5: memref<8x32xf32, #tpu.memory_space<vmem>>, %arg6: memref<1x32x96xbf16, #tpu.memory_space<vmem>>, %arg7: memref<1x32x32xbf16, #tpu.memory_space<vmem>>, %arg8: memref<1x32x128xbf16, #tpu.memory_space<vmem>>, %arg9: memref<1x128x32xbf16, #tpu.memory_space<vmem>>, %arg10: memref<1x9x32xf32, #tpu.memory_space<vmem>>, %arg11: memref<1x1x128xf32, #tpu.memory_space<vmem>>, %arg12: memref<2x32xf32, #tpu.memory_space<vmem>>, %arg13: memref<32x128xf32, #tpu.memory_space<vmem>>, %arg14: memref<8x128xf32, #tpu.memory_space<vmem>>, %arg15: memref<8x32xf32, #tpu.memory_space<vmem>>) attributes {dimension_semantics = [#tpu.dimension_semantics<parallel>, #tpu.dimension_semantics<arbitrary>], iteration_bounds = array<i64: 2, 2>, scalar_prefetch = 2 : i64, scratch_operands = 1 : i64, tpu.core_type = #tpu.core_type<tc>, window_params = [{pipeline_mode = #tpu.pipeline_mode<synchronous>, transform_indices = @transform_0, window_bounds = array<i64: 64, 32>}, {pipeline_mode = #tpu.pipeline_mode<synchronous>, transform_indices = @transform_1, window_bounds = array<i64: 8, 32>}, {transform_indices = @transform_2, window_bounds = array<i64: 1, 32, 96>}, {transform_indices = @transform_3, window_bounds = array<i64: 1, 32, 32>}, {transform_indices = @transform_4, window_bounds = array<i64: 1, 32, 128>}, {transform_indices = @transform_5, window_bounds = array<i64: 1, 128, 32>}, {transform_indices = @transform_6, window_bounds = array<i64: 1, 9, 32>}, {transform_indices = @transform_7, window_bounds = array<i64: 1, 1, 128>}, {pipeline_mode = #tpu.pipeline_mode<synchronous>, transform_indices = @transform_8, window_bounds = array<i64: 2, 32>}, {pipeline_mode = #tpu.pipeline_mode<synchronous>, transform_indices = @transform_9, window_bounds = array<i64: 32, 128>}, {transform_indices = @transform_10, window_bounds = array<i64: 8, 128>}]} {
    %c0_i32 = arith.constant 0 : i32
    %0 = arith.cmpi eq, %arg1, %c0_i32 : i32
    %1 = arith.extui %0 : i1 to i32
    %c0_i32_0 = arith.constant 0 : i32
    %2 = arith.cmpi ne, %1, %c0_i32_0 : i32
    scf.if %2 {
      %175 = arith.index_cast %arg0 : i32 to index
      %c0_57 = arith.constant 0 : index
      %176 = memref.load %arg2[%175, %c0_57] : memref<2x8xi32, #tpu.memory_space<smem>>
      %177 = arith.index_cast %176 : i32 to index
      %c0_58 = arith.constant 0 : index
      %178 = vector.load %arg4[%177, %c0_58] : memref<64x32xf32, #tpu.memory_space<vmem>>, vector<1x32xf32>
      %c0_59 = arith.constant 0 : index
      %c0_60 = arith.constant 0 : index
      %179 = vector.load %arg5[%c0_59, %c0_60] : memref<8x32xf32, #tpu.memory_space<vmem>>, vector<1x32xf32>
      %180 = arith.addf %178, %179 : vector<1x32xf32>
      %c0_61 = arith.constant 0 : index
      %c0_62 = arith.constant 0 : index
      %181 = vector.load %arg15[%c0_61, %c0_62] : memref<8x32xf32, #tpu.memory_space<vmem>>, vector<1x32xf32>
      tpu.vector_store %arg15[%c0_61, %c0_62], %180 {strides = array<i32>} : memref<8x32xf32, #tpu.memory_space<vmem>>, vector<1x32xf32>,
      %182 = arith.index_cast %arg0 : i32 to index
      %c1 = arith.constant 1 : index
      %183 = memref.load %arg2[%182, %c1] : memref<2x8xi32, #tpu.memory_space<smem>>
      %184 = arith.index_cast %183 : i32 to index
      %c0_63 = arith.constant 0 : index
      %185 = vector.load %arg4[%184, %c0_63] : memref<64x32xf32, #tpu.memory_space<vmem>>, vector<1x32xf32>
      %c1_64 = arith.constant 1 : index
      %c0_65 = arith.constant 0 : index
      %186 = vector.load %arg5[%c1_64, %c0_65] : memref<8x32xf32, #tpu.memory_space<vmem>>, vector<1x32xf32>
      %187 = arith.addf %185, %186 : vector<1x32xf32>
      %c1_66 = arith.constant 1 : index
      %c0_67 = arith.constant 0 : index
      %188 = vector.load %arg15[%c1_66, %c0_67] : memref<8x32xf32, #tpu.memory_space<vmem>>, vector<1x32xf32>
      tpu.vector_store %arg15[%c1_66, %c0_67], %187 {strides = array<i32>} : memref<8x32xf32, #tpu.memory_space<vmem>>, vector<1x32xf32>,
      %189 = arith.index_cast %arg0 : i32 to index
      %c2 = arith.constant 2 : index
      %190 = memref.load %arg2[%189, %c2] : memref<2x8xi32, #tpu.memory_space<smem>>
      %191 = arith.index_cast %190 : i32 to index
      %c0_68 = arith.constant 0 : index
      %192 = vector.load %arg4[%191, %c0_68] : memref<64x32xf32, #tpu.memory_space<vmem>>, vector<1x32xf32>
      %c2_69 = arith.constant 2 : index
      %c0_70 = arith.constant 0 : index
      %193 = vector.load %arg5[%c2_69, %c0_70] : memref<8x32xf32, #tpu.memory_space<vmem>>, vector<1x32xf32>
      %194 = arith.addf %192, %193 : vector<1x32xf32>
      %c2_71 = arith.constant 2 : index
      %c0_72 = arith.constant 0 : index
      %195 = vector.load %arg15[%c2_71, %c0_72] : memref<8x32xf32, #tpu.memory_space<vmem>>, vector<1x32xf32>
      tpu.vector_store %arg15[%c2_71, %c0_72], %194 {strides = array<i32>} : memref<8x32xf32, #tpu.memory_space<vmem>>, vector<1x32xf32>,
      %196 = arith.index_cast %arg0 : i32 to index
      %c3 = arith.constant 3 : index
      %197 = memref.load %arg2[%196, %c3] : memref<2x8xi32, #tpu.memory_space<smem>>
      %198 = arith.index_cast %197 : i32 to index
      %c0_73 = arith.constant 0 : index
      %199 = vector.load %arg4[%198, %c0_73] : memref<64x32xf32, #tpu.memory_space<vmem>>, vector<1x32xf32>
      %c3_74 = arith.constant 3 : index
      %c0_75 = arith.constant 0 : index
      %200 = vector.load %arg5[%c3_74, %c0_75] : memref<8x32xf32, #tpu.memory_space<vmem>>, vector<1x32xf32>
      %201 = arith.addf %199, %200 : vector<1x32xf32>
      %c3_76 = arith.constant 3 : index
      %c0_77 = arith.constant 0 : index
      %202 = vector.load %arg15[%c3_76, %c0_77] : memref<8x32xf32, #tpu.memory_space<vmem>>, vector<1x32xf32>
      tpu.vector_store %arg15[%c3_76, %c0_77], %201 {strides = array<i32>} : memref<8x32xf32, #tpu.memory_space<vmem>>, vector<1x32xf32>,
      %203 = arith.index_cast %arg0 : i32 to index
      %c4 = arith.constant 4 : index
      %204 = memref.load %arg2[%203, %c4] : memref<2x8xi32, #tpu.memory_space<smem>>
      %205 = arith.index_cast %204 : i32 to index
      %c0_78 = arith.constant 0 : index
      %206 = vector.load %arg4[%205, %c0_78] : memref<64x32xf32, #tpu.memory_space<vmem>>, vector<1x32xf32>
      %c4_79 = arith.constant 4 : index
      %c0_80 = arith.constant 0 : index
      %207 = vector.load %arg5[%c4_79, %c0_80] : memref<8x32xf32, #tpu.memory_space<vmem>>, vector<1x32xf32>
      %208 = arith.addf %206, %207 : vector<1x32xf32>
      %c4_81 = arith.constant 4 : index
      %c0_82 = arith.constant 0 : index
      %209 = vector.load %arg15[%c4_81, %c0_82] : memref<8x32xf32, #tpu.memory_space<vmem>>, vector<1x32xf32>
      tpu.vector_store %arg15[%c4_81, %c0_82], %208 {strides = array<i32>} : memref<8x32xf32, #tpu.memory_space<vmem>>, vector<1x32xf32>,
      %210 = arith.index_cast %arg0 : i32 to index
      %c5 = arith.constant 5 : index
      %211 = memref.load %arg2[%210, %c5] : memref<2x8xi32, #tpu.memory_space<smem>>
      %212 = arith.index_cast %211 : i32 to index
      %c0_83 = arith.constant 0 : index
      %213 = vector.load %arg4[%212, %c0_83] : memref<64x32xf32, #tpu.memory_space<vmem>>, vector<1x32xf32>
      %c5_84 = arith.constant 5 : index
      %c0_85 = arith.constant 0 : index
      %214 = vector.load %arg5[%c5_84, %c0_85] : memref<8x32xf32, #tpu.memory_space<vmem>>, vector<1x32xf32>
      %215 = arith.addf %213, %214 : vector<1x32xf32>
      %c5_86 = arith.constant 5 : index
      %c0_87 = arith.constant 0 : index
      %216 = vector.load %arg15[%c5_86, %c0_87] : memref<8x32xf32, #tpu.memory_space<vmem>>, vector<1x32xf32>
      tpu.vector_store %arg15[%c5_86, %c0_87], %215 {strides = array<i32>} : memref<8x32xf32, #tpu.memory_space<vmem>>, vector<1x32xf32>,
      %217 = arith.index_cast %arg0 : i32 to index
      %c6 = arith.constant 6 : index
      %218 = memref.load %arg2[%217, %c6] : memref<2x8xi32, #tpu.memory_space<smem>>
      %219 = arith.index_cast %218 : i32 to index
      %c0_88 = arith.constant 0 : index
      %220 = vector.load %arg4[%219, %c0_88] : memref<64x32xf32, #tpu.memory_space<vmem>>, vector<1x32xf32>
      %c6_89 = arith.constant 6 : index
      %c0_90 = arith.constant 0 : index
      %221 = vector.load %arg5[%c6_89, %c0_90] : memref<8x32xf32, #tpu.memory_space<vmem>>, vector<1x32xf32>
      %222 = arith.addf %220, %221 : vector<1x32xf32>
      %c6_91 = arith.constant 6 : index
      %c0_92 = arith.constant 0 : index
      %223 = vector.load %arg15[%c6_91, %c0_92] : memref<8x32xf32, #tpu.memory_space<vmem>>, vector<1x32xf32>
      tpu.vector_store %arg15[%c6_91, %c0_92], %222 {strides = array<i32>} : memref<8x32xf32, #tpu.memory_space<vmem>>, vector<1x32xf32>,
      %224 = arith.index_cast %arg0 : i32 to index
      %c7 = arith.constant 7 : index
      %225 = memref.load %arg2[%224, %c7] : memref<2x8xi32, #tpu.memory_space<smem>>
      %226 = arith.index_cast %225 : i32 to index
      %c0_93 = arith.constant 0 : index
      %227 = vector.load %arg4[%226, %c0_93] : memref<64x32xf32, #tpu.memory_space<vmem>>, vector<1x32xf32>
      %c7_94 = arith.constant 7 : index
      %c0_95 = arith.constant 0 : index
      %228 = vector.load %arg5[%c7_94, %c0_95] : memref<8x32xf32, #tpu.memory_space<vmem>>, vector<1x32xf32>
      %229 = arith.addf %227, %228 : vector<1x32xf32>
      %c7_96 = arith.constant 7 : index
      %c0_97 = arith.constant 0 : index
      %230 = vector.load %arg15[%c7_96, %c0_97] : memref<8x32xf32, #tpu.memory_space<vmem>>, vector<1x32xf32>
      tpu.vector_store %arg15[%c7_96, %c0_97], %229 {strides = array<i32>} : memref<8x32xf32, #tpu.memory_space<vmem>>, vector<1x32xf32>,
    } else {
    }
    %c0 = arith.constant 0 : index
    %c0_1 = arith.constant 0 : index
    %c0_2 = arith.constant 0 : index
    %3 = vector.load %arg10[%c0, %c0_1, %c0_2] : memref<1x9x32xf32, #tpu.memory_space<vmem>>, vector<1x9x32xf32>
    %4 = vector.shape_cast %3 : vector<1x9x32xf32> to vector<9x32xf32>
    %5 = vector.extract_strided_slice %4 {offsets = [0, 0], sizes = [1, 32], strides = [1, 1]} : vector<9x32xf32> to vector<1x32xf32>
    %6 = vector.extract_strided_slice %4 {offsets = [1, 0], sizes = [1, 32], strides = [1, 1]} : vector<9x32xf32> to vector<1x32xf32>
    %7 = vector.extract_strided_slice %4 {offsets = [2, 0], sizes = [1, 32], strides = [1, 1]} : vector<9x32xf32> to vector<1x32xf32>
    %8 = vector.extract_strided_slice %4 {offsets = [3, 0], sizes = [1, 32], strides = [1, 1]} : vector<9x32xf32> to vector<1x32xf32>
    %9 = vector.extract_strided_slice %4 {offsets = [4, 0], sizes = [1, 32], strides = [1, 1]} : vector<9x32xf32> to vector<1x32xf32>
    %10 = vector.extract_strided_slice %4 {offsets = [5, 0], sizes = [1, 32], strides = [1, 1]} : vector<9x32xf32> to vector<1x32xf32>
    %11 = vector.extract_strided_slice %4 {offsets = [6, 0], sizes = [1, 32], strides = [1, 1]} : vector<9x32xf32> to vector<1x32xf32>
    %12 = vector.extract_strided_slice %4 {offsets = [7, 0], sizes = [1, 32], strides = [1, 1]} : vector<9x32xf32> to vector<1x32xf32>
    %13 = vector.extract_strided_slice %4 {offsets = [8, 0], sizes = [1, 32], strides = [1, 1]} : vector<9x32xf32> to vector<1x32xf32>
    %c0_3 = arith.constant 0 : index
    %c0_4 = arith.constant 0 : index
    %c0_5 = arith.constant 0 : index
    %14 = vector.load %arg11[%c0_3, %c0_4, %c0_5] : memref<1x1x128xf32, #tpu.memory_space<vmem>>, vector<1x1x128xf32>
    %15 = vector.shape_cast %14 : vector<1x1x128xf32> to vector<1x128xf32>
    %c0_6 = arith.constant 0 : index
    %c0_7 = arith.constant 0 : index
    %16 = vector.load %arg15[%c0_6, %c0_7] : memref<8x32xf32, #tpu.memory_space<vmem>>, vector<8x32xf32>
    %cst = arith.constant dense<0.000000e+00> : vector<8xf32>
    %17 = vector.multi_reduction <add>, %16, %cst [1] : vector<8x32xf32> to vector<8xf32>
    %18 = vector.shape_cast %17 : vector<8xf32> to vector<8x1xf32>
    %cst_8 = arith.constant 3.200000e+01 : f32
    %19 = vector.broadcast %cst_8 : f32 to vector<8x1xf32>
    %20 = arith.divf %18, %19 : vector<8x1xf32>
    %21 = vector.broadcast %20 : vector<8x1xf32> to vector<8x32xf32>
    %22 = arith.subf %16, %21 : vector<8x32xf32>
    %23 = arith.mulf %22, %22 : vector<8x32xf32>
    %cst_9 = arith.constant dense<0.000000e+00> : vector<8xf32>
    %24 = vector.multi_reduction <add>, %23, %cst_9 [1] : vector<8x32xf32> to vector<8xf32>
    %25 = vector.shape_cast %24 : vector<8xf32> to vector<8x1xf32>
    %cst_10 = arith.constant 3.200000e+01 : f32
    %26 = vector.broadcast %cst_10 : f32 to vector<8x1xf32>
    %27 = arith.divf %25, %26 : vector<8x1xf32>
    %28 = vector.broadcast %20 : vector<8x1xf32> to vector<8x32xf32>
    %29 = arith.subf %16, %28 : vector<8x32xf32>
    %cst_11 = arith.constant 9.99999974E-6 : f32
    %30 = vector.broadcast %cst_11 : f32 to vector<8x1xf32>
    %31 = arith.addf %27, %30 : vector<8x1xf32>
    %32 = math.rsqrt %31 : vector<8x1xf32>
    %33 = vector.broadcast %32 : vector<8x1xf32> to vector<8x32xf32>
    %34 = arith.mulf %29, %33 : vector<8x32xf32>
    %35 = vector.broadcast %5 : vector<1x32xf32> to vector<8x32xf32>
    %36 = arith.mulf %34, %35 : vector<8x32xf32>
    %37 = vector.broadcast %6 : vector<1x32xf32> to vector<8x32xf32>
    %38 = arith.addf %36, %37 : vector<8x32xf32>
    %39 = arith.truncf %38 : vector<8x32xf32> to vector<8x32xbf16>
    %c0_12 = arith.constant 0 : index
    %c0_13 = arith.constant 0 : index
    %c0_14 = arith.constant 0 : index
    %40 = vector.load %arg6[%c0_12, %c0_13, %c0_14] : memref<1x32x96xbf16, #tpu.memory_space<vmem>>, vector<1x32x96xbf16>
    %41 = vector.shape_cast %40 : vector<1x32x96xbf16> to vector<32x96xbf16>
    %cst_15 = arith.constant dense<0.000000e+00> : vector<8x96xf32>
    %42 = tpu.matmul %39, %41, %cst_15 {dimension_numbers = #tpu.dot_dimension_numbers<[1], [0], [0], [1], [0, 0, 1, 1], [], []>} : vector<8x32xbf16>, vector<32x96xbf16>, vector<8x96xf32> -> vector<8x96xf32>
    %43 = vector.extract_strided_slice %42 {offsets = [0, 0], sizes = [8, 32], strides = [1, 1]} : vector<8x96xf32> to vector<8x32xf32>
    %44 = vector.broadcast %7 : vector<1x32xf32> to vector<8x32xf32>
    %45 = arith.addf %43, %44 : vector<8x32xf32>
    %cst_16 = arith.constant 0.353553385 : f32
    %46 = vector.broadcast %cst_16 : f32 to vector<8x32xf32>
    %47 = arith.mulf %45, %46 : vector<8x32xf32>
    %48 = vector.extract_strided_slice %42 {offsets = [0, 32], sizes = [8, 32], strides = [1, 1]} : vector<8x96xf32> to vector<8x32xf32>
    %49 = vector.broadcast %8 : vector<1x32xf32> to vector<8x32xf32>
    %50 = arith.addf %48, %49 : vector<8x32xf32>
    %51 = vector.extract_strided_slice %42 {offsets = [0, 64], sizes = [8, 32], strides = [1, 1]} : vector<8x96xf32> to vector<8x32xf32>
    %52 = vector.broadcast %9 : vector<1x32xf32> to vector<8x32xf32>
    %53 = arith.addf %51, %52 : vector<8x32xf32>
    %54 = tpu.iota {dimensions = array<i32: 0>} : vector<8x8xi32>
    %55 = tpu.iota {dimensions = array<i32: 1>} : vector<8x8xi32>
    %56 = arith.cmpi sle, %55, %54 : vector<8x8xi32>
    %cst_17 = arith.constant 0.000000e+00 : f32
    %cst_18 = arith.constant -1.000000e+30 : f32
    %57 = vector.broadcast %cst_17 : f32 to vector<8x8xf32>
    %58 = vector.broadcast %cst_18 : f32 to vector<8x8xf32>
    %59 = arith.select %56, %57, %58 : vector<8x8xi1>, vector<8x8xf32>
    %60 = vector.extract_strided_slice %47 {offsets = [0, 0], sizes = [8, 8], strides = [1, 1]} : vector<8x32xf32> to vector<8x8xf32>
    %61 = vector.extract_strided_slice %50 {offsets = [0, 0], sizes = [8, 8], strides = [1, 1]} : vector<8x32xf32> to vector<8x8xf32>
    %62 = vector.extract_strided_slice %53 {offsets = [0, 0], sizes = [8, 8], strides = [1, 1]} : vector<8x32xf32> to vector<8x8xf32>
    %cst_19 = arith.constant dense<0.000000e+00> : vector<8x8xf32>
    %63 = tpu.matmul %60, %61, %cst_19 {dimension_numbers = #tpu.dot_dimension_numbers<[1], [1], [0], [0], [0, 0, 1, 0], [], []>} : vector<8x8xf32>, vector<8x8xf32>, vector<8x8xf32> -> vector<8x8xf32>
    %64 = arith.addf %63, %59 : vector<8x8xf32>
    %cst_20 = arith.constant dense<0xFF800000> : vector<8xf32>
    %65 = vector.multi_reduction <maximumf>, %64, %cst_20 [1] : vector<8x8xf32> to vector<8xf32>
    %66 = vector.shape_cast %65 : vector<8xf32> to vector<8x1xf32>
    %67 = vector.broadcast %66 : vector<8x1xf32> to vector<8x8xf32>
    %68 = arith.subf %64, %67 : vector<8x8xf32>
    %69 = math.exp %68 : vector<8x8xf32>
    %cst_21 = arith.constant dense<0.000000e+00> : vector<8xf32>
    %70 = vector.multi_reduction <add>, %69, %cst_21 [1] : vector<8x8xf32> to vector<8xf32>
    %71 = vector.shape_cast %70 : vector<8xf32> to vector<8x1xf32>
    %72 = vector.broadcast %71 : vector<8x1xf32> to vector<8x8xf32>
    %73 = arith.divf %69, %72 : vector<8x8xf32>
    %cst_22 = arith.constant dense<0.000000e+00> : vector<8x8xf32>
    %74 = tpu.matmul %73, %62, %cst_22 {dimension_numbers = #tpu.dot_dimension_numbers<[1], [0], [0], [1], [0, 0, 1, 1], [], []>} : vector<8x8xf32>, vector<8x8xf32>, vector<8x8xf32> -> vector<8x8xf32>
    %75 = vector.extract_strided_slice %47 {offsets = [0, 8], sizes = [8, 8], strides = [1, 1]} : vector<8x32xf32> to vector<8x8xf32>
    %76 = vector.extract_strided_slice %50 {offsets = [0, 8], sizes = [8, 8], strides = [1, 1]} : vector<8x32xf32> to vector<8x8xf32>
    %77 = vector.extract_strided_slice %53 {offsets = [0, 8], sizes = [8, 8], strides = [1, 1]} : vector<8x32xf32> to vector<8x8xf32>
    %cst_23 = arith.constant dense<0.000000e+00> : vector<8x8xf32>
    %78 = tpu.matmul %75, %76, %cst_23 {dimension_numbers = #tpu.dot_dimension_numbers<[1], [1], [0], [0], [0, 0, 1, 0], [], []>} : vector<8x8xf32>, vector<8x8xf32>, vector<8x8xf32> -> vector<8x8xf32>
    %79 = arith.addf %78, %59 : vector<8x8xf32>
    %cst_24 = arith.constant dense<0xFF800000> : vector<8xf32>
    %80 = vector.multi_reduction <maximumf>, %79, %cst_24 [1] : vector<8x8xf32> to vector<8xf32>
    %81 = vector.shape_cast %80 : vector<8xf32> to vector<8x1xf32>
    %82 = vector.broadcast %81 : vector<8x1xf32> to vector<8x8xf32>
    %83 = arith.subf %79, %82 : vector<8x8xf32>
    %84 = math.exp %83 : vector<8x8xf32>
    %cst_25 = arith.constant dense<0.000000e+00> : vector<8xf32>
    %85 = vector.multi_reduction <add>, %84, %cst_25 [1] : vector<8x8xf32> to vector<8xf32>
    %86 = vector.shape_cast %85 : vector<8xf32> to vector<8x1xf32>
    %87 = vector.broadcast %86 : vector<8x1xf32> to vector<8x8xf32>
    %88 = arith.divf %84, %87 : vector<8x8xf32>
    %cst_26 = arith.constant dense<0.000000e+00> : vector<8x8xf32>
    %89 = tpu.matmul %88, %77, %cst_26 {dimension_numbers = #tpu.dot_dimension_numbers<[1], [0], [0], [1], [0, 0, 1, 1], [], []>} : vector<8x8xf32>, vector<8x8xf32>, vector<8x8xf32> -> vector<8x8xf32>
    %90 = vector.extract_strided_slice %47 {offsets = [0, 16], sizes = [8, 8], strides = [1, 1]} : vector<8x32xf32> to vector<8x8xf32>
    %91 = vector.extract_strided_slice %50 {offsets = [0, 16], sizes = [8, 8], strides = [1, 1]} : vector<8x32xf32> to vector<8x8xf32>
    %92 = vector.extract_strided_slice %53 {offsets = [0, 16], sizes = [8, 8], strides = [1, 1]} : vector<8x32xf32> to vector<8x8xf32>
    %cst_27 = arith.constant dense<0.000000e+00> : vector<8x8xf32>
    %93 = tpu.matmul %90, %91, %cst_27 {dimension_numbers = #tpu.dot_dimension_numbers<[1], [1], [0], [0], [0, 0, 1, 0], [], []>} : vector<8x8xf32>, vector<8x8xf32>, vector<8x8xf32> -> vector<8x8xf32>
    %94 = arith.addf %93, %59 : vector<8x8xf32>
    %cst_28 = arith.constant dense<0xFF800000> : vector<8xf32>
    %95 = vector.multi_reduction <maximumf>, %94, %cst_28 [1] : vector<8x8xf32> to vector<8xf32>
    %96 = vector.shape_cast %95 : vector<8xf32> to vector<8x1xf32>
    %97 = vector.broadcast %96 : vector<8x1xf32> to vector<8x8xf32>
    %98 = arith.subf %94, %97 : vector<8x8xf32>
    %99 = math.exp %98 : vector<8x8xf32>
    %cst_29 = arith.constant dense<0.000000e+00> : vector<8xf32>
    %100 = vector.multi_reduction <add>, %99, %cst_29 [1] : vector<8x8xf32> to vector<8xf32>
    %101 = vector.shape_cast %100 : vector<8xf32> to vector<8x1xf32>
    %102 = vector.broadcast %101 : vector<8x1xf32> to vector<8x8xf32>
    %103 = arith.divf %99, %102 : vector<8x8xf32>
    %cst_30 = arith.constant dense<0.000000e+00> : vector<8x8xf32>
    %104 = tpu.matmul %103, %92, %cst_30 {dimension_numbers = #tpu.dot_dimension_numbers<[1], [0], [0], [1], [0, 0, 1, 1], [], []>} : vector<8x8xf32>, vector<8x8xf32>, vector<8x8xf32> -> vector<8x8xf32>
    %105 = vector.extract_strided_slice %47 {offsets = [0, 24], sizes = [8, 8], strides = [1, 1]} : vector<8x32xf32> to vector<8x8xf32>
    %106 = vector.extract_strided_slice %50 {offsets = [0, 24], sizes = [8, 8], strides = [1, 1]} : vector<8x32xf32> to vector<8x8xf32>
    %107 = vector.extract_strided_slice %53 {offsets = [0, 24], sizes = [8, 8], strides = [1, 1]} : vector<8x32xf32> to vector<8x8xf32>
    %cst_31 = arith.constant dense<0.000000e+00> : vector<8x8xf32>
    %108 = tpu.matmul %105, %106, %cst_31 {dimension_numbers = #tpu.dot_dimension_numbers<[1], [1], [0], [0], [0, 0, 1, 0], [], []>} : vector<8x8xf32>, vector<8x8xf32>, vector<8x8xf32> -> vector<8x8xf32>
    %109 = arith.addf %108, %59 : vector<8x8xf32>
    %cst_32 = arith.constant dense<0xFF800000> : vector<8xf32>
    %110 = vector.multi_reduction <maximumf>, %109, %cst_32 [1] : vector<8x8xf32> to vector<8xf32>
    %111 = vector.shape_cast %110 : vector<8xf32> to vector<8x1xf32>
    %112 = vector.broadcast %111 : vector<8x1xf32> to vector<8x8xf32>
    %113 = arith.subf %109, %112 : vector<8x8xf32>
    %114 = math.exp %113 : vector<8x8xf32>
    %cst_33 = arith.constant dense<0.000000e+00> : vector<8xf32>
    %115 = vector.multi_reduction <add>, %114, %cst_33 [1] : vector<8x8xf32> to vector<8xf32>
    %116 = vector.shape_cast %115 : vector<8xf32> to vector<8x1xf32>
    %117 = vector.broadcast %116 : vector<8x1xf32> to vector<8x8xf32>
    %118 = arith.divf %114, %117 : vector<8x8xf32>
    %cst_34 = arith.constant dense<0.000000e+00> : vector<8x8xf32>
    %119 = tpu.matmul %118, %107, %cst_34 {dimension_numbers = #tpu.dot_dimension_numbers<[1], [0], [0], [1], [0, 0, 1, 1], [], []>} : vector<8x8xf32>, vector<8x8xf32>, vector<8x8xf32> -> vector<8x8xf32>
    %120 = tpu.concatenate %74, %89, %104, %119 in 1 : vector<8x8xf32>, vector<8x8xf32>, vector<8x8xf32>, vector<8x8xf32> -> vector<8x32xf32>
    %121 = arith.truncf %120 : vector<8x32xf32> to vector<8x32xbf16>
    %c0_35 = arith.constant 0 : index
    %c0_36 = arith.constant 0 : index
    %c0_37 = arith.constant 0 : index
    %122 = vector.load %arg7[%c0_35, %c0_36, %c0_37] : memref<1x32x32xbf16, #tpu.memory_space<vmem>>, vector<1x32x32xbf16>
    %123 = vector.shape_cast %122 : vector<1x32x32xbf16> to vector<32x32xbf16>
    %cst_38 = arith.constant dense<0.000000e+00> : vector<8x32xf32>
    %124 = tpu.matmul %121, %123, %cst_38 {dimension_numbers = #tpu.dot_dimension_numbers<[1], [0], [0], [1], [0, 0, 1, 1], [], []>} : vector<8x32xbf16>, vector<32x32xbf16>, vector<8x32xf32> -> vector<8x32xf32>
    %125 = arith.addf %16, %124 : vector<8x32xf32>
    %126 = vector.broadcast %10 : vector<1x32xf32> to vector<8x32xf32>
    %127 = arith.addf %125, %126 : vector<8x32xf32>
    %cst_39 = arith.constant dense<0.000000e+00> : vector<8xf32>
    %128 = vector.multi_reduction <add>, %127, %cst_39 [1] : vector<8x32xf32> to vector<8xf32>
    %129 = vector.shape_cast %128 : vector<8xf32> to vector<8x1xf32>
    %cst_40 = arith.constant 3.200000e+01 : f32
    %130 = vector.broadcast %cst_40 : f32 to vector<8x1xf32>
    %131 = arith.divf %129, %130 : vector<8x1xf32>
    %132 = vector.broadcast %131 : vector<8x1xf32> to vector<8x32xf32>
    %133 = arith.subf %127, %132 : vector<8x32xf32>
    %134 = arith.mulf %133, %133 : vector<8x32xf32>
    %cst_41 = arith.constant dense<0.000000e+00> : vector<8xf32>
    %135 = vector.multi_reduction <add>, %134, %cst_41 [1] : vector<8x32xf32> to vector<8xf32>
    %136 = vector.shape_cast %135 : vector<8xf32> to vector<8x1xf32>
    %cst_42 = arith.constant 3.200000e+01 : f32
    %137 = vector.broadcast %cst_42 : f32 to vector<8x1xf32>
    %138 = arith.divf %136, %137 : vector<8x1xf32>
    %139 = vector.broadcast %131 : vector<8x1xf32> to vector<8x32xf32>
    %140 = arith.subf %127, %139 : vector<8x32xf32>
    %cst_43 = arith.constant 9.99999974E-6 : f32
    %141 = vector.broadcast %cst_43 : f32 to vector<8x1xf32>
    %142 = arith.addf %138, %141 : vector<8x1xf32>
    %143 = math.rsqrt %142 : vector<8x1xf32>
    %144 = vector.broadcast %143 : vector<8x1xf32> to vector<8x32xf32>
    %145 = arith.mulf %140, %144 : vector<8x32xf32>
    %146 = vector.broadcast %11 : vector<1x32xf32> to vector<8x32xf32>
    %147 = arith.mulf %145, %146 : vector<8x32xf32>
    %148 = vector.broadcast %12 : vector<1x32xf32> to vector<8x32xf32>
    %149 = arith.addf %147, %148 : vector<8x32xf32>
    %150 = arith.truncf %149 : vector<8x32xf32> to vector<8x32xbf16>
    %c0_44 = arith.constant 0 : index
    %c0_45 = arith.constant 0 : index
    %c0_46 = arith.constant 0 : index
    %151 = vector.load %arg8[%c0_44, %c0_45, %c0_46] : memref<1x32x128xbf16, #tpu.memory_space<vmem>>, vector<1x32x128xbf16>
    %152 = vector.shape_cast %151 : vector<1x32x128xbf16> to vector<32x128xbf16>
    %cst_47 = arith.constant dense<0.000000e+00> : vector<8x128xf32>
    %153 = tpu.matmul %150, %152, %cst_47 {dimension_numbers = #tpu.dot_dimension_numbers<[1], [0], [0], [1], [0, 0, 1, 1], [], []>} : vector<8x32xbf16>, vector<32x128xbf16>, vector<8x128xf32> -> vector<8x128xf32>
    %154 = vector.broadcast %15 : vector<1x128xf32> to vector<8x128xf32>
    %155 = arith.addf %153, %154 : vector<8x128xf32>
    %cst_48 = arith.constant 1.702000e+00 : f32
    %156 = vector.broadcast %cst_48 : f32 to vector<8x128xf32>
    %157 = arith.mulf %156, %155 : vector<8x128xf32>
    %158 = arith.negf %157 : vector<8x128xf32>
    %159 = math.exp %158 : vector<8x128xf32>
    %cst_49 = arith.constant 1.000000e+00 : f32
    %160 = vector.broadcast %cst_49 : f32 to vector<8x128xf32>
    %161 = arith.addf %160, %159 : vector<8x128xf32>
    %162 = arith.divf %160, %161 : vector<8x128xf32>
    %163 = arith.mulf %155, %162 : vector<8x128xf32>
    %164 = arith.truncf %163 : vector<8x128xf32> to vector<8x128xbf16>
    %c0_50 = arith.constant 0 : index
    %c0_51 = arith.constant 0 : index
    %c0_52 = arith.constant 0 : index
    %165 = vector.load %arg9[%c0_50, %c0_51, %c0_52] : memref<1x128x32xbf16, #tpu.memory_space<vmem>>, vector<1x128x32xbf16>
    %166 = vector.shape_cast %165 : vector<1x128x32xbf16> to vector<128x32xbf16>
    %cst_53 = arith.constant dense<0.000000e+00> : vector<8x32xf32>
    %167 = tpu.matmul %164, %166, %cst_53 {dimension_numbers = #tpu.dot_dimension_numbers<[1], [0], [0], [1], [0, 0, 1, 1], [], []>} : vector<8x128xbf16>, vector<128x32xbf16>, vector<8x32xf32> -> vector<8x32xf32>
    %168 = arith.addf %127, %167 : vector<8x32xf32>
    %169 = vector.broadcast %13 : vector<1x32xf32> to vector<8x32xf32>
    %170 = arith.addf %168, %169 : vector<8x32xf32>
    %c0_54 = arith.constant 0 : index
    %c0_55 = arith.constant 0 : index
    %171 = vector.load %arg15[%c0_54, %c0_55] : memref<8x32xf32, #tpu.memory_space<vmem>>, vector<8x32xf32>
    tpu.vector_store %arg15[%c0_54, %c0_55], %170 {strides = array<i32>} : memref<8x32xf32, #tpu.memory_space<vmem>>, vector<8x32xf32>,
    %c1_i32 = arith.constant 1 : i32
    %172 = arith.cmpi eq, %arg1, %c1_i32 : i32
    %173 = arith.extui %172 : i1 to i32
    %c0_i32_56 = arith.constant 0 : i32
    %174 = arith.cmpi ne, %173, %c0_i32_56 : i32
    scf.if %174 {
      %175 = arith.index_cast %arg0 : i32 to index
      %176 = memref.load %arg3[%175] : memref<2xi32, #tpu.memory_space<smem>>
      %177 = arith.index_cast %176 : i32 to index
      %c0_57 = arith.constant 0 : index
      %178 = vector.load %arg15[%177, %c0_57] : memref<8x32xf32, #tpu.memory_space<vmem>>, vector<1x32xf32>
      %c0_58 = arith.constant 0 : index
      %c0_59 = arith.constant 0 : index
      %179 = vector.load %arg12[%c0_58, %c0_59] : memref<2x32xf32, #tpu.memory_space<vmem>>, vector<2x32xf32>
      %180 = vector.extract_strided_slice %179 {offsets = [0, 0], sizes = [1, 32], strides = [1, 1]} : vector<2x32xf32> to vector<1x32xf32>
      %181 = vector.extract_strided_slice %179 {offsets = [1, 0], sizes = [1, 32], strides = [1, 1]} : vector<2x32xf32> to vector<1x32xf32>
      %cst_60 = arith.constant dense<0.000000e+00> : vector<1xf32>
      %182 = vector.multi_reduction <add>, %178, %cst_60 [1] : vector<1x32xf32> to vector<1xf32>
      %183 = vector.shape_cast %182 : vector<1xf32> to vector<1x1xf32>
      %cst_61 = arith.constant 3.200000e+01 : f32
      %184 = vector.broadcast %cst_61 : f32 to vector<1x1xf32>
      %185 = arith.divf %183, %184 : vector<1x1xf32>
      %186 = vector.broadcast %185 : vector<1x1xf32> to vector<1x32xf32>
      %187 = arith.subf %178, %186 : vector<1x32xf32>
      %188 = arith.mulf %187, %187 : vector<1x32xf32>
      %cst_62 = arith.constant dense<0.000000e+00> : vector<1xf32>
      %189 = vector.multi_reduction <add>, %188, %cst_62 [1] : vector<1x32xf32> to vector<1xf32>
      %190 = vector.shape_cast %189 : vector<1xf32> to vector<1x1xf32>
      %cst_63 = arith.constant 3.200000e+01 : f32
      %191 = vector.broadcast %cst_63 : f32 to vector<1x1xf32>
      %192 = arith.divf %190, %191 : vector<1x1xf32>
      %193 = vector.broadcast %185 : vector<1x1xf32> to vector<1x32xf32>
      %194 = arith.subf %178, %193 : vector<1x32xf32>
      %cst_64 = arith.constant 9.99999974E-6 : f32
      %195 = vector.broadcast %cst_64 : f32 to vector<1x1xf32>
      %196 = arith.addf %192, %195 : vector<1x1xf32>
      %197 = math.rsqrt %196 : vector<1x1xf32>
      %198 = vector.broadcast %197 : vector<1x1xf32> to vector<1x32xf32>
      %199 = arith.mulf %194, %198 : vector<1x32xf32>
      %200 = arith.mulf %199, %180 : vector<1x32xf32>
      %201 = arith.addf %200, %181 : vector<1x32xf32>
      %c0_65 = arith.constant 0 : index
      %c0_66 = arith.constant 0 : index
      %202 = vector.load %arg13[%c0_65, %c0_66] : memref<32x128xf32, #tpu.memory_space<vmem>>, vector<32x128xf32>
      %cst_67 = arith.constant dense<0.000000e+00> : vector<1x128xf32>
      %203 = tpu.matmul %201, %202, %cst_67 {dimension_numbers = #tpu.dot_dimension_numbers<[1], [0], [0], [1], [0, 0, 1, 1], [], []>} : vector<1x32xf32>, vector<32x128xf32>, vector<1x128xf32> -> vector<1x128xf32>
      %204 = vector.shape_cast %203 : vector<1x128xf32> to vector<1x128xf32>
      %205 = vector.broadcast %204 : vector<1x128xf32> to vector<8x128xf32>
      %c0_68 = arith.constant 0 : index
      %c0_69 = arith.constant 0 : index
      %206 = vector.load %arg14[%c0_68, %c0_69] : memref<8x128xf32, #tpu.memory_space<vmem>>, vector<8x128xf32>
      tpu.vector_store %arg14[%c0_68, %c0_69], %205 {strides = array<i32>} : memref<8x128xf32, #tpu.memory_space<vmem>>, vector<8x128xf32>,
    } else {
    }
    return
  }
  func.func @transform_0(%arg0: i32, %arg1: i32, %arg2: memref<2x8xi32, #tpu.memory_space<smem>>, %arg3: memref<2xi32, #tpu.memory_space<smem>>) -> (i32, i32) {
    %c0_i32 = arith.constant 0 : i32
    %c0_i32_0 = arith.constant 0 : i32
    %c0_i32_1 = arith.constant 0 : i32
    return %c0_i32, %c0_i32_0 : i32, i32
  }
  func.func @transform_1(%arg0: i32, %arg1: i32, %arg2: memref<2x8xi32, #tpu.memory_space<smem>>, %arg3: memref<2xi32, #tpu.memory_space<smem>>) -> (i32, i32) {
    %c0_i32 = arith.constant 0 : i32
    %c0_i32_0 = arith.constant 0 : i32
    %c0_i32_1 = arith.constant 0 : i32
    return %c0_i32, %c0_i32_0 : i32, i32
  }
  func.func @transform_2(%arg0: i32, %arg1: i32, %arg2: memref<2x8xi32, #tpu.memory_space<smem>>, %arg3: memref<2xi32, #tpu.memory_space<smem>>) -> (i32, i32, i32) {
    %c0_i32 = arith.constant 0 : i32
    %c0_i32_0 = arith.constant 0 : i32
    %c0_i32_1 = arith.constant 0 : i32
    return %arg1, %c0_i32, %c0_i32_0 : i32, i32, i32
  }
  func.func @transform_3(%arg0: i32, %arg1: i32, %arg2: memref<2x8xi32, #tpu.memory_space<smem>>, %arg3: memref<2xi32, #tpu.memory_space<smem>>) -> (i32, i32, i32) {
    %c0_i32 = arith.constant 0 : i32
    %c0_i32_0 = arith.constant 0 : i32
    %c0_i32_1 = arith.constant 0 : i32
    return %arg1, %c0_i32, %c0_i32_0 : i32, i32, i32
  }
  func.func @transform_4(%arg0: i32, %arg1: i32, %arg2: memref<2x8xi32, #tpu.memory_space<smem>>, %arg3: memref<2xi32, #tpu.memory_space<smem>>) -> (i32, i32, i32) {
    %c0_i32 = arith.constant 0 : i32
    %c0_i32_0 = arith.constant 0 : i32
    %c0_i32_1 = arith.constant 0 : i32
    return %arg1, %c0_i32, %c0_i32_0 : i32, i32, i32
  }
  func.func @transform_5(%arg0: i32, %arg1: i32, %arg2: memref<2x8xi32, #tpu.memory_space<smem>>, %arg3: memref<2xi32, #tpu.memory_space<smem>>) -> (i32, i32, i32) {
    %c0_i32 = arith.constant 0 : i32
    %c0_i32_0 = arith.constant 0 : i32
    %c0_i32_1 = arith.constant 0 : i32
    return %arg1, %c0_i32, %c0_i32_0 : i32, i32, i32
  }
  func.func @transform_6(%arg0: i32, %arg1: i32, %arg2: memref<2x8xi32, #tpu.memory_space<smem>>, %arg3: memref<2xi32, #tpu.memory_space<smem>>) -> (i32, i32, i32) {
    %c0_i32 = arith.constant 0 : i32
    %c0_i32_0 = arith.constant 0 : i32
    %c0_i32_1 = arith.constant 0 : i32
    return %arg1, %c0_i32, %c0_i32_0 : i32, i32, i32
  }
  func.func @transform_7(%arg0: i32, %arg1: i32, %arg2: memref<2x8xi32, #tpu.memory_space<smem>>, %arg3: memref<2xi32, #tpu.memory_space<smem>>) -> (i32, i32, i32) {
    %c0_i32 = arith.constant 0 : i32
    %c0_i32_0 = arith.constant 0 : i32
    %c0_i32_1 = arith.constant 0 : i32
    return %arg1, %c0_i32, %c0_i32_0 : i32, i32, i32
  }
  func.func @transform_8(%arg0: i32, %arg1: i32, %arg2: memref<2x8xi32, #tpu.memory_space<smem>>, %arg3: memref<2xi32, #tpu.memory_space<smem>>) -> (i32, i32) {
    %c0_i32 = arith.constant 0 : i32
    %c0_i32_0 = arith.constant 0 : i32
    %c0_i32_1 = arith.constant 0 : i32
    return %c0_i32, %c0_i32_0 : i32, i32
  }
  func.func @transform_9(%arg0: i32, %arg1: i32, %arg2: memref<2x8xi32, #tpu.memory_space<smem>>, %arg3: memref<2xi32, #tpu.memory_space<smem>>) -> (i32, i32) {
    %c0_i32 = arith.constant 0 : i32
    %c0_i32_0 = arith.constant 0 : i32
    %c0_i32_1 = arith.constant 0 : i32
    return %c0_i32, %c0_i32_0 : i32, i32
  }
  func.func @transform_10(%arg0: i32, %arg1: i32, %arg2: memref<2x8xi32, #tpu.memory_space<smem>>, %arg3: memref<2xi32, #tpu.memory_space<smem>>) -> (i32, i32) {
    %c0_i32 = arith.constant 0 : i32
    %c0_i32_0 = arith.constant 0 : i32
    return %arg0, %c0_i32 : i32, i32
  }
}

</mosaic_0001>

<bundles_post_ra>
// kernel: encode_text.1
= control target key start
LH: loop header
LB: loop body
LE: loop exit
PB: predicated region body
PF: predicated region fallthrough
CT: control target
= control target key end

     0   :  { %s2621_s0 = inlined_call_operand.vmem [shape: s32[2,8], index: 0, kind: input, shape index: {}]   ;;  %s2622_s2 = inlined_call_operand.vmem [shape: f32[64,32], index: 2, kind: input, shape index: {}]   ;;  %s2623_s3 = inlined_call_operand.vmem [shape: f32[8,32], index: 3, kind: input, shape index: {}]   ;;  %s2624_s4 = inlined_call_operand.vmem [shape: bf16[2,32,96], index: 4, kind: input, shape index: {}]   ;;  %s2625_s5 = inlined_call_operand.vmem [shape: bf16[2,32,32], index: 5, kind: input, shape index: {}]   ;;  %s2626_s6 = inlined_call_operand.vmem [shape: bf16[2,32,128], index: 6, kind: input, shape index: {}]   ;;  %s2627_s7 = inlined_call_operand.vmem [shape: bf16[2,128,32], index: 7, kind: input, shape index: {}]   ;;  %s2628_s8 = inlined_call_operand.vmem [shape: f32[2,9,32], index: 8, kind: input, shape index: {}]   ;;  %s2629_s9 = inlined_call_operand.vmem [shape: f32[2,1,128], index: 9, kind: input, shape index: {}]   ;;  %s2630_s10 = inlined_call_operand.vmem [shape: f32[2,32], index: 10, kind: input, shape index: {}]   ;;  %s2631_s11 = inlined_call_operand.vmem [shape: f32[32,128], index: 11, kind: input, shape index: {}]   ;;  %s2632_s12 = inlined_call_operand.vmem [shape: f32[16,128], index: 12, kind: output, shape index: {}]   ;;  %s2633_s1 = inlined_call_operand.vmem [shape: s32[2], index: 1, kind: input, shape index: {}]  }
   0x1   :  { %2638 = sst [smem:[#allocation13_spill]] %s2624_s4  ;;  %s17_s23 = sshll.u32 %s2621_s0, 4  ;;  %s18_s23 = int_to_ptr.vmem [resolvable:$true] %s17_s23 }
   0x2   :  { %2639 = sst [smem:[#allocation14_spill]] %s2625_s5  ;;  %s21_s26 = sshll.u32 %s2633_s1, 4  ;;  %s22_s26 = int_to_ptr.vmem [resolvable:$true] %s21_s26 }
   0x3   :  { %2640 = sst [smem:[#allocation15_spill]] %s2626_s6  ;;  %s2145_s27 = scalar_lea.vmem %s18_s23, 32 }
   0x4   :  { %2641 = sst [smem:[#allocation16_spill]] %s2627_s7  ;;  %p2146_p0 = scmp.ne.s32.totalorder %s18_s23, %s2145_s27 }
   0x5   :  { %2642 = sst [smem:[#allocation17_spill]] %s2628_s8  ;;  %p2150_p1 = scmp.lt.s32.totalorder %s18_s23, %s18_s23 }
   0x6   :  { %2643 = sst [smem:[#allocation18_spill]] %s2630_s10  ;;  %p2151_p2 = scmp.lt.s32.totalorder %s2145_s27, %s2145_s27 }
   0x7   :  { %2644 = sst [smem:[#allocation19_spill]] %s2631_s11 }
   0x8   :  { %2645 = sst [smem:[#allocation20_spill]] %s2632_s12  ;;  %p2152_p3 = por %p2151_p2, %p2150_p1 }
   0xa   :  { %p2153_p4 = pnand %p2152_p3, %p2146_p0 }
   0xc   :  { %2156 = shalt.err (!%p2153_p4)  }
   0xd   :  { %s2211_s28 = smov [#allocation4]   ;;  %s2157_s29 = scalar_lea.vmem %s22_s26, 16 }
   0xe   :  { %20 = dma.vmem_to_smem %s18_s23, 32, %s2211_s28, [#allocation3] }
   0xf   :  { %p2158_p5 = scmp.ne.s32.totalorder %s22_s26, %s2157_s29  ;;  %p2162_p6 = scmp.lt.s32.totalorder %s22_s26, %s22_s26 }
  0x10   :  { %p2163_p7 = scmp.lt.s32.totalorder %s2157_s29, %s2157_s29 }
  0x12   :  { %p2164_p8 = por %p2163_p7, %p2162_p6 }
  0x14   :  { %p2165_p9 = pnand %p2164_p8, %p2158_p5 }
  0x16   :  { %2168 = shalt.err (!%p2165_p9)  }
  0x17   :  { %s2212_s0 = smov [#allocation5]  }
  0x18   :  { %24 = dma.vmem_to_smem %s22_s26, 16, %s2212_s0, [#allocation3] }
  0x19   :  { %2189 = dma.done.wait [#allocation3], 48 }
  0x1a   :  { %2190 = vsyncadd [#allocation3], 4294967248 }
  0x1b   :  { %26 = sfence }
  0x1c   :  { %s2304_s1 = smov 0   ;;  %s2306_s30 = smov 0  }
  0x1d   :  { %s2308_s13 = smov 0   ;;  %s2310_s14 = smov 0  }
  0x1e   :  { %s2312_s15 = smov 0  }
  0x1f LB: > { %2646 = sst [smem:[#allocation7_spill]] %s2201_s13  ;;  %s41_s16 = sadd.s32 1, %s2201_s13  ;;  %s2209_s15 = sphi %s2312_s15, %s32_s15   ;;  %s2205_s14 = sphi %s2310_s14, %s2666_s14   ;;  %s2201_s13 = sphi %s2308_s13, %s2665_s13   ;;  %s2197_s30 = sphi %s2306_s30, %s2664_s30   ;;  %s2193_s1 = sphi %s2304_s1, %s2663_s1  }
  0x20   : > { %2647 = sst [smem:[#allocation8_spill]] %s2205_s14  ;;  %s44_s17 = sadd.s32 1, %s2205_s14 }
  0x21   : > { %2648 = sst [smem:[#allocation9_spill]] %s2209_s15  ;;  %p42_p10 = scmp.ge.s32.totalorder %s41_s16, 2 }
  0x22   : > { %p1854_p11 = scmp.ge.s32.totalorder %s2209_s15, 1  ;;  %p384_p12 = scmp.lt.s32.totalorder %s2209_s15, 5 }
  0x23   : > { %s2668_s16 = smov (%p42_p10, %s41_s16), 0  ;;  %s2670_s17 = smov (!%p42_p10, %s44_s17), %s2205_s14 }
  0x24   : > { %2649 = sst [smem:[#allocation10_spill]] %s2668_s16  ;;  %p385_p13 = pnand %p1854_p11, %p384_p12 }
  0x25   : > { %p46_p0 = scmp.ge.s32.totalorder %s2670_s17, 2 }
  0x26   : > { %388 = sbr.rel (%p385_p13) target bundleno = 3535 (0xdcf), region = 60 }
  0x27   : > { %s2672_s17 = smov (%p46_p0, %s2670_s17), 0 }
  0x28   : > { %2650 = sst [smem:[#allocation11_spill]] %s2672_s17 }
  0x2b   : > { %p444_p1 = scmp.lt.s32.totalorder %s2193_s1, 1  ;;  %p472_p2 = scmp.lt.s32.totalorder %s2197_s30, 1 }
  0x2c   : > { %s2651_s4 = sld [smem:[#allocation13_spill]]  ;;  %p1866_p3 = scmp.ne.s32.totalorder %s2193_s1, 0 }
  0x2d   : > { %s2341_s18 = scalar_select %p444_p1, %s2193_s1, 1 }
  0x2e   : > { %s473_s19 = scalar_select %p472_p2, %s2197_s30, 1 }
  0x2f   : > { %s1904_s20 = sshll.u32 %s2341_s18, 4  ;;  %s1907_s21 = sshll.u32 %s2341_s18, 6 }
  0x30   : > { %s2652_s5 = sld [smem:[#allocation14_spill]]  ;;  %s1865_s26 = sshll.u32 %s473_s19, 3 }
  0x31   : > { %s2653_s6 = sld [smem:[#allocation15_spill]]  ;;  %s1867_s16 = sshll.u32 (!%p1866_p3), %s2197_s30, 7 }
  0x32   : > { %s2349_s24 = scalar_lea.vmem %s2651_s4, %s1904_s20  ;;  %s2654_s7 = sld [smem:[#allocation16_spill]] }
  0x33   : > { %s2655_s8 = sld [smem:[#allocation17_spill]]  ;;  %s496_s15 = sadd.s32 (!%p1866_p3), 2, %s1867_s16 }
  0x34   : > { %s2656_s12 = sld [smem:[#allocation20_spill]]  ;;  %s503_s29 = sadd.s32 (!%p1866_p3), 3, %s1867_s16 }
  0x35   : > { %s482_s17 = sld [smem:[#allocation4 + %s1867_s16]] (!%p1866_p3)  ;;  %s510_s4 = sadd.s32 (!%p1866_p3), 4, %s1867_s16 }
  0x36   : > { %s2354_s27 = scalar_lea.vmem %s2652_s5, %s1904_s20  ;;  %s2382_s23 = sld [smem:[#allocation4 + %s510_s4]] (!%p1866_p3) }
  0x37   : > { %s2359_s0 = scalar_lea.vmem %s2653_s6, %s1904_s20  ;;  %480 = sbr.rel (%p1866_p3) target bundleno = 74 (0x4a), region = 64 }
  0x38   : > { %s2364_s14 = scalar_lea.vmem %s2654_s7, %s1907_s21  ;;  %s489_s21 = sadd.s32 (!%p1866_p3), 1, %s1867_s16 }
  0x39   : > { %s2369_s22 = scalar_lea.vmem %s2655_s8, %s1904_s20  ;;  %s490_s13 = sld [smem:[#allocation4 + %s489_s21]] (!%p1866_p3) }
  0x3a   : > { %s2378_s28 = scalar_lea.vmem %s2656_s12, %s1865_s26  ;;  %s497_s20 = sld [smem:[#allocation4 + %s496_s15]] (!%p1866_p3) }
  0x3b   : > { %2657 = sst [smem:[#allocation12_spill]] %s2378_s28  ;;  %s517_s19 = sadd.s32 (!%p1866_p3), 5, %s1867_s16 }
  0x3c   : > { %s504_s6 = sld [smem:[#allocation4 + %s503_s29]]  ;;  %v485_v0 = vld [vmem:[%s2623_s3] sm:$0x1]  ;;  %s524_s26 = sadd.s32 6, %s1867_s16  ;;  %v493_v1 = vld [vmem:[%s2623_s3 + $0x1] sm:$0x1] }
  0x3d   : > { %s2387_s10 = sld [smem:[#allocation4 + %s517_s19]]  ;;  %s483_s12 = scalar_lea.vmem %s2622_s2, %s482_s17  ;;  %vm487_vm0 = vcmask 253952   ;;  %v500_v3 = vld [vmem:[%s2623_s3 + $0x2] sm:$0x1]  ;;  %v507_v6 = vld [vmem:[%s2623_s3 + $0x3] sm:$0x1] }
  0x3e   : > { %s2395_s15 = sld [smem:[#allocation4 + %s524_s26]]  ;;  %v484_v2 = vld [vmem:[%s483_s12] sm:$0x1]  ;;  %s531_s11 = sadd.s32 7, %s1867_s16  ;;  %v514_v9 = vld [vmem:[%s2623_s3 + $0x4] sm:$0x1] }
  0x3f   : > { %s491_s25 = scalar_lea.vmem %s2622_s2, %s490_s13  ;;  %v486_v4 = vadd.f32 %v485_v0, %v484_v2  ;;  %s532_s26 = sld [smem:[#allocation4 + %s531_s11]]  ;;  %v521_v12 = vld [vmem:[%s2623_s3 + $0x5] sm:$0x1]  ;;  %v528_v15 = vld [vmem:[%s2623_s3 + $0x6] sm:$0x1] }
  0x40   : > { %v492_v5 = vld [vmem:[%s491_s25] sm:$0x1]  ;;  %s498_s28 = scalar_lea.vmem %s2622_s2, %s497_s20  ;;  %s512_s19 = scalar_lea.vmem %s2622_s2, %s2382_s23  ;;  %v535_v20 = vld [vmem:[%s2623_s3 + $0x7] sm:$0x1] }
  0x41   : > { %v494_v7 = vadd.f32 %v493_v1, %v492_v5  ;;  %v499_v8 = vld [vmem:[%s498_s28] sm:$0x1]  ;;  %488 = vst.msk [vmem:[#allocation2] sm:$0x1] %vm487_vm0, %v486_v4 }
  0x42   : > { %s505_s29 = scalar_lea.vmem %s2622_s2, %s504_s6  ;;  %v501_v10 = vadd.f32 %v500_v3, %v499_v8  ;;  %v513_v14 = vld [vmem:[%s512_s19] sm:$0x1] }
  0x43   : > { %v506_v11 = vld [vmem:[%s505_s29] sm:$0x1]  ;;  %495 = vst.msk [vmem:[#allocation2 + $0x1] sm:$0x1] %vm487_vm0, %v494_v7  ;;  %s519_s8 = scalar_lea.vmem %s2622_s2, %s2387_s10  ;;  %v515_v16 = vadd.f32 %v514_v9, %v513_v14 }
  0x44   : > { %v508_v13 = vadd.f32 %v507_v6, %v506_v11  ;;  %502 = vst.msk [vmem:[#allocation2 + $0x2] sm:$0x1] %vm487_vm0, %v501_v10  ;;  %v520_v17 = vld [vmem:[%s519_s8] sm:$0x1]  ;;  %s526_s13 = scalar_lea.vmem %s2622_s2, %s2395_s15 }
  0x45   : > { %v522_v18 = vadd.f32 %v521_v12, %v520_v17  ;;  %v527_v19 = vld [vmem:[%s526_s13] sm:$0x1]  ;;  %516 = vst.msk [vmem:[#allocation2 + $0x4] sm:$0x1] %vm487_vm0, %v515_v16  ;;  %s533_s4 = scalar_lea.vmem %s2622_s2, %s532_s26 }
  0x46   : > { %509 = vst.msk [vmem:[#allocation2 + $0x3] sm:$0x1] %vm487_vm0, %v508_v13  ;;  %v529_v21 = vadd.f32 %v528_v15, %v527_v19  ;;  %v534_v22 = vld [vmem:[%s533_s4] sm:$0x1] }
  0x47   : > { %523 = vst.msk [vmem:[#allocation2 + $0x5] sm:$0x1] %vm487_vm0, %v522_v18  ;;  %v536_v23 = vadd.f32 %v535_v20, %v534_v22 }
  0x48   : > { %530 = vst.msk [vmem:[#allocation2 + $0x6] sm:$0x1] %vm487_vm0, %v529_v21 }
  0x49   : > { %537 = vst.msk [vmem:[#allocation2 + $0x7] sm:$0x1] %vm487_vm0, %v536_v23 }
  0x4a PF: > { %vm542_vm1 = vcmask 261120   ;;  %v2105_v31 = vld [vmem:[%s2349_s24 + $0x8] sm:$0xff]   ;;  %v2213_v32 = vmov 0.0   ;;  %vm2214_vm2 = vmmov 0   ;;  %v2106_v33 = vld [vmem:[%s2349_s24] sm:$0xff]   ;;  %v557_v34 = vlaneseq  ;;  %s2215_s24 = smov 32   ;;  %s2658_s13 = scalar_lea.vmem %s2629_s9, %s2341_s18 }
  0x4b   : > { %1948 = vmatprep.subr.bf16.mxu0 %v2213_v32  ;;  %1952 = vmatprep.mubr.msk.bf16.mxu0 %vm2214_vm2, %v2213_v32  ;;  %v2467_v37 = vld [vmem:[%s2369_s22] sm:$0xff]  ;;  %s2216_s15 = smov 96   ;;  %s2217_s26 = smov 64   ;;  %vm660_vm3 = vcmask 64512   ;;  %v2223_v4 = vmov -1e+30  }
  0x4c   : > { %1949 = vmatpush3.bf16.msra.mxu0 %v2105_v31  ;;  %1961 = vmatprep.subr.mxu1 %v2213_v32  ;;  %v2463_v35 = vshrl.u32 %v557_v34, 7  ;;  %s2218_s20 = smov 120   ;;  %s2219_s25 = smov 80   ;;  %v654_v3 = vand.u32 127, %v557_v34  ;;  %vm1332_vm5 = vcmask 130048   ;;  %vm1334_vm6 = vcmask 195584  }
  0x4d   : > { %1950 = vmatprep.subr.bf16.mxu0 %v2213_v32  ;;  %1963 = vmatprep.mubr.msk.f32.mxu1 %vm2214_vm2, %v2213_v32  ;;  %s2220_s19 = smov 112   ;;  %s2221_s11 = smov 72  }
  0x4e   : > { %v635_v36 = vsub.s32 3, %v2463_v35  ;;  %v559_v42 = vsub.s32 0, %v2463_v35  ;;  %v564_v43 = vsub.s32 1, %v2463_v35  ;;  %v644_v52 = vsub.s32 4, %v2463_v35  ;;  %s2222_s5 = smov 104   ;;  %s2224_s6 = smov 88  }
  0x4f   : > { %v629_v59 = vsub.s32 2, %v2463_v35  ;;  %vm655_vm4 = vcmp.le.s32.totalorder %v654_v3, %v2463_v35  ;;  %s2225_s7 = smov 48   ;;  %s2226_s8 = smov 56  }
  0x50   : > { %v2447_v24 = vld [vmem:[#allocation2] sm:$0xff]  ;;  %1951 = vmatpush3.bf16.msra.mxu0 %v2106_v33  ;;  %v636_v38 = vrot.slane %v2467_v37, %v635_v36  ;;  %v560_v44 = vrot.slane %v2467_v37, %v559_v42  ;;  %v565_v47 = vrot.slane %v2467_v37, %v564_v43  ;;  %v645_v56 = vrot.slane %v2467_v37, %v644_v52  ;;  %s2227_s28 = smov 40   ;;  %s2228_s17 = smov 8  }
  0x51   : > { %v543_v25 = vsel %vm542_vm1, %v2447_v24, 0.0  ;;  %1956 = vmatprep.subr.mxu0 %v2213_v32  ;;  %v630_v60 = vrot.slane %v2467_v37, %v629_v59  ;;  %v656_v5 = vsel %vm655_vm4, 0.0, %v2223_v4  ;;  %s2229_s23 = smov 16   ;;  %s2230_s12 = smov 24  }
  0x52   : > { %544 = vadd.xlane.f32.xlu0 %v543_v25  ;;  %638 = vrot.lane.b32.xlu1 %v636_v38, %s2215_s24  ;;  %p1900_p4 = scmp.ne.s32.totalorder %s2193_s1, 1 }
  0x53   : > { %s2659_s29 = sld [smem:[#allocation19_spill]] (!%p1900_p4) }
  0xc4   : > { %v639_v51 = vpop.permute.xlu1 %638 }
  0xdb   : > { %v545_v26 = vpop.xlane.xlu0 %544 }
  0xdc   : > { %v547_v27 = vmul.f32 0.03125, %v545_v26 }
  0xde   : > { %v548_v28 = vsub.f32 %v2447_v24, %v547_v27 }
  0xe0   : > { %v549_v29 = vmul.f32 %v548_v28, %v548_v28 }
  0xe2   : > { %v550_v30 = vsel %vm542_vm1, %v549_v29, 0.0 }
  0xe3   : > { %551 = vadd.xlane.f32.xlu0 %v550_v30 }
 0x16c   : > { %v552_v39 = vpop.xlane.xlu0 %551 }
 0x16d   : > { %v553_v40 = vmul.f32 0.03125, %v552_v39 }
 0x16f   : > { %v554_v41 = vadd.f32 1e-05, %v553_v40 }
 0x171   : > { %2119 = vrsqrt.f32 %v554_v41 }
 0x17e   : > { %v2120_v45 = vpop.eup %2119 }
 0x17f   : > { %v556_v46 = vmul.f32 %v2120_v45, %v548_v28 }
 0x181   : > { %v561_v48 = vmul.f32 %v560_v44, %v556_v46 }
 0x183   : > { %v566_v49 = vadd.f32 %v565_v47, %v561_v48 }
 0x185   : > { %v567_v50 = vpack.c.bf16 %v566_v49, %v566_v49 }
 0x187   : > { %1953 = vmatmul.mubr.msk.bf16.vlgmr.msra.gmra.mxu0 %vm542_vm1, %v567_v50 }
 0x188   : > { %1958 = vmatprep.mubr.msk.f32.mxu0 %vm2214_vm2, %v2213_v32 }
 0x247   : > { %v621_v53 = vpop.f32.mrf.mxu0 }
 0x248   : > { %v641_v54 = vadd.f32 %v639_v51, %v621_v53  ;;  %v631_v61 = vadd.f32 %v630_v60, %v621_v53 }
 0x249   : > { %v1954_v55 = vpop.f32.mrf.mxu0 }
 0x24a   : > { %658 = vrot.lane.b32.xlu1 %v641_v54, %s2216_s15  ;;  %v632_v63 = vmul.f32 0.35355338, %v631_v61  ;;  %s2660_s15 = sld [smem:[#allocation12_spill]] (!%p1900_p4) }
 0x24b   : > { %v624_v57 = vpop.f32.mrf.mxu0 }
 0x24d   : > { %v1955_v58 = vpop.f32.mrf.mxu0 }
 0x24e   : > { %647 = vrot.lane.b32.xlu1 %v645_v56, %s2217_s26 }
 0x2bc   : > { %v659_v62 = vpop.permute.xlu1 %658 }
 0x2bd   : > { %1957 = vmatpush3.xpose.msk.msra.mxu0 %vm660_vm3, %v659_v62 }
 0x2be   : > { %1971 = vmatprep.subr.mxu0 %v2213_v32 }
 0x2c0   : > { %v648_v0 = vpop.permute.xlu1 %647  ;;  %1959 = vmatmul.mubr.msk.f32.vlgmr.msra.gmra.mxu0 %vm660_vm3, %v632_v63 }
 0x2c1   : > { %v2486_v1 = vadd.f32 %v648_v0, %v621_v53  ;;  %1973 = vmatprep.mubr.msk.f32.mxu0 %vm2214_vm2, %v2213_v32 }
 0x2c3   : > { %748 = vrot.lane.b32.xlu1 %v2486_v1, %s2217_s26 }
 0x2c7   : > { %824 = vrot.lane.b32.xlu1 %v632_v63, %s2218_s20 }
 0x2cb   : > { %991 = vrot.lane.b32.xlu1 %v641_v54, %s2219_s25  ;;  %s2661_s25 = sld [smem:[#allocation18_spill]] (!%p1900_p4) }
 0x2cf   : > { %989 = vrot.lane.b32.xlu1 %v632_v63, %s2220_s19 }
 0x2d3   : > { %1156 = vrot.lane.b32.xlu1 %v641_v54, %s2221_s11 }
 0x2d7   : > { %1154 = vrot.lane.b32.xlu1 %v632_v63, %s2222_s5 }
 0x335   : > { %v749_v2 = vpop.permute.xlu1 %748 }
 0x336   : > { %1962 = vmatpush3.msra.mxu1 %v749_v2 }
 0x337   : > { %1966 = vmatprep.subr.mxu1 %v2213_v32 }
 0x339   : > { %v825_v16 = vpop.permute.xlu1 %824 }
 0x33d   : > { %v992_v17 = vpop.permute.xlu1 %991 }
 0x341   : > { %v990_v20 = vpop.permute.xlu1 %989 }
 0x345   : > { %v1157_v22 = vpop.permute.xlu1 %1156 }
 0x349   : > { %v1155_v23 = vpop.permute.xlu1 %1154 }
 0x380   : > { %v732_v6 = vpop.f32.mrf.mxu0 }
 0x381   : > { %v733_v7 = vadd.f32 %v732_v6, %v656_v5  ;;  %v2107_v6 = vld [vmem:[%s2354_s27 + $0x8] sm:$0xff]  }
 0x382   : > { %v1960_v8 = vpop.f32.mrf.mxu0 }
 0x383   : > { %v736_v9 = vsel %vm660_vm3, %v733_v7, -inf }
 0x384   : > { %737 = vmax.xlane.f32.xlu0 %v736_v9 }
 0x40d   : > { %v738_v10 = vpop.xlane.xlu0 %737 }
 0x40e   : > { %v739_v11 = vsub.f32 %v733_v7, %v738_v10 }
 0x410   : > { %v740_v12 = vmul.f32 1.442695, %v739_v11  ;;  %v2108_v11 = vld [vmem:[%s2354_s27] sm:$0xff]  }
 0x412   : > { %2121 = vpow2.f32 %v740_v12 }
 0x41f   : > { %v2122_v13 = vpop.eup %2121 }
 0x420   : > { %v742_v14 = vsel %vm660_vm3, %v2122_v13, 0.0 }
 0x421   : > { %743 = vadd.xlane.f32.xlu0 %v742_v14 }
 0x437   : > { %826 = vrot.lane.b32.xlu0 %v641_v54, %s2224_s6 }
 0x4aa   : > { %v744_v15 = vpop.xlane.xlu0 %743 }
 0x4ab   : > { %2123 = vrcp.f32 %v744_v15 }
 0x4ae   : > { %v827_v21 = vpop.permute.xlu0 %826 }
 0x4b8   : > { %v2124_v18 = vpop.eup %2123 }
 0x4b9   : > { %v746_v19 = vmul.f32 %v2124_v18, %v2122_v13 }
 0x4bb   : > { %1964 = vmatmul.mubr.msk.f32.vlgmr.msra.gmra.mxu1 %vm660_vm3, %v746_v19 }
 0x4bc   : > { %1967 = vmatpush3.xpose.msk.msra.mxu1 %vm660_vm3, %v827_v21  ;;  %1968 = vmatprep.mubr.msk.f32.mxu1 %vm2214_vm2, %v2213_v32  ;;  %v1399_v21 = vsub.s32 5, %v2463_v35 }
 0x4bd   : > { %1976 = vmatprep.subr.mxu1 %v2213_v32 }
 0x4bf   : > { %1969 = vmatmul.mubr.msk.f32.vlgmr.msra.gmra.mxu1 %vm660_vm3, %v825_v16 }
 0x4c0   : > { %1977 = vmatpush3.xpose.msk.msra.mxu1 %vm660_vm3, %v992_v17  ;;  %1978 = vmatprep.mubr.msk.f32.mxu1 %vm2214_vm2, %v2213_v32 }
 0x4c1   : > { %1986 = vmatprep.subr.mxu1 %v2213_v32 }
 0x4c3   : > { %1979 = vmatmul.mubr.msk.f32.vlgmr.msra.gmra.mxu1 %vm660_vm3, %v990_v20 }
 0x4c4   : > { %1987 = vmatpush3.xpose.msk.msra.mxu1 %vm660_vm3, %v1157_v22  ;;  %1988 = vmatprep.mubr.msk.f32.mxu1 %vm2214_vm2, %v2213_v32  ;;  %v1400_v22 = vrot.slane %v2467_v37, %v1399_v21 }
 0x4c5   : > { %2012 = vmatprep.subr.bf16.mxu1 %v2213_v32 }
 0x4c7   : > { %1989 = vmatmul.mubr.msk.f32.vlgmr.msra.gmra.mxu1 %vm660_vm3, %v1155_v23 }
 0x4c8   : > { %2028 = vmatprep.mubr.msk.bf16.mxu1 %vm2214_vm2, %v2213_v32 }
 0x57b   : > { %v2513_v25 = vpop.f32.mrf.mxu1 }
 0x57d   : > { %v1965_v26 = vpop.f32.mrf.mxu1 }
 0x57f   : > { %v898_v27 = vpop.f32.mrf.mxu1 }
 0x580   : > { %v899_v28 = vadd.f32 %v898_v27, %v656_v5 }
 0x581   : > { %v1970_v29 = vpop.f32.mrf.mxu1 }
 0x582   : > { %v902_v30 = vsel %vm660_vm3, %v899_v28, -inf }
 0x583   : > { %903 = vmax.xlane.f32.xlu1 %v902_v30  ;;  %v1063_v31 = vpop.f32.mrf.mxu1 }
 0x584   : > { %v1064_v33 = vadd.f32 %v1063_v31, %v656_v5 }
 0x585   : > { %v1980_v34 = vpop.f32.mrf.mxu1 }
 0x586   : > { %v1067_v36 = vsel %vm660_vm3, %v1064_v33, -inf }
 0x587   : > { %1068 = vmax.xlane.f32.xlu0 %v1067_v36  ;;  %v1228_v38 = vpop.f32.mrf.mxu1 }
 0x588   : > { %v1229_v39 = vadd.f32 %v1228_v38, %v656_v5 }
 0x589   : > { %v1990_v40 = vpop.f32.mrf.mxu1 }
 0x58a   : > { %v1232_v41 = vsel %vm660_vm3, %v1229_v39, -inf }
 0x58b   : > { %1233 = vmax.xlane.f32.xlu0 %v1232_v41 }
 0x60c   : > { %v904_v43 = vpop.xlane.xlu1 %903 }
 0x60d   : > { %v905_v44 = vsub.f32 %v899_v28, %v904_v43 }
 0x60f   : > { %v906_v45 = vmul.f32 1.442695, %v905_v44  ;;  %v1417_v44 = vsub.s32 6, %v2463_v35 }
 0x610   : > { %v1069_v46 = vpop.xlane.xlu0 %1068 }
 0x611   : > { %2125 = vpow2.f32 %v906_v45  ;;  %v1070_v47 = vsub.f32 %v1064_v33, %v1069_v46  ;;  %v1422_v45 = vsub.s32 7, %v2463_v35  ;;  %v1418_v46 = vrot.slane %v2467_v37, %v1417_v44 }
 0x613   : > { %v1071_v48 = vmul.f32 1.442695, %v1070_v47 }
 0x614   : > { %v1234_v53 = vpop.xlane.xlu0 %1233 }
 0x615   : > { %2127 = vpow2.f32 %v1071_v48  ;;  %v1235_v54 = vsub.f32 %v1229_v39, %v1234_v53  ;;  %v2109_v39 = vld [vmem:[%s2359_s0 + $0x8] sm:$0xff]   ;;  %v2111_v53 = vld [vmem:[%s2364_s14 + $0x38] sm:$0xff]  }
 0x616   : > { %2013 = vmatpush3.bf16.msra.mxu1 %v2111_v53 }
 0x617   : > { %v1236_v55 = vmul.f32 1.442695, %v1235_v54  ;;  %2014 = vmatprep.subr.bf16.mxu1 %v2213_v32  ;;  %v2112_v54 = vld [vmem:[%s2364_s14 + $0x30] sm:$0xff]  }
 0x619   : > { %2129 = vpow2.f32 %v1236_v55  ;;  %v2113_v55 = vld [vmem:[%s2364_s14 + $0x28] sm:$0xff]  }
 0x61a   : > { %2015 = vmatpush3.bf16.msra.mxu1 %v2112_v54 }
 0x61b   : > { %2016 = vmatprep.subr.bf16.mxu1 %v2213_v32 }
 0x61e   : > { %v2126_v49 = vpop.eup %2125  ;;  %2017 = vmatpush3.bf16.msra.mxu1 %v2113_v55 }
 0x61f   : > { %v908_v50 = vsel %vm660_vm3, %v2126_v49, 0.0  ;;  %2018 = vmatprep.subr.bf16.mxu1 %v2213_v32 }
 0x620   : > { %909 = vadd.xlane.f32.xlu1 %v908_v50 }
 0x622   : > { %v2128_v51 = vpop.eup %2127 }
 0x623   : > { %v1073_v52 = vsel %vm660_vm3, %v2128_v51, 0.0 }
 0x624   : > { %1074 = vadd.xlane.f32.xlu0 %v1073_v52 }
 0x626   : > { %v2130_v56 = vpop.eup %2129 }
 0x627   : > { %v1238_v57 = vsel %vm660_vm3, %v2130_v56, 0.0 }
 0x631   : > { %1078 = vrot.lane.b32.xlu1 %v2486_v1, %s2225_s7 }
 0x63a   : > { %913 = vrot.lane.b32.xlu0 %v2486_v1, %s2226_s8 }
 0x655   : > { %1239 = vadd.xlane.f32.xlu1 %v1238_v57  ;;  %v2116_v57 = vld [vmem:[%s2364_s14 + $0x10] sm:$0xff]  }
 0x666   : > { %1243 = vrot.lane.b32.xlu1 %v2486_v1, %s2227_s28 }
 0x6a9   : > { %v910_v58 = vpop.xlane.xlu1 %909 }
 0x6aa   : > { %2131 = vrcp.f32 %v910_v58  ;;  %v2117_v58 = vld [vmem:[%s2364_s14 + $0x8] sm:$0xff]  }
 0x6ad   : > { %v1075_v59 = vpop.xlane.xlu0 %1074  ;;  %v1079_v63 = vpop.permute.xlu1 %1078 }
 0x6ae   : > { %2133 = vrcp.f32 %v1075_v59  ;;  %v2118_v59 = vld [vmem:[%s2364_s14] sm:$0xff]  }
 0x6b1   : > { %v914_v60 = vpop.permute.xlu0 %913 }
 0x6b2   : > { %1972 = vmatpush3.msra.mxu0 %v914_v60  ;;  %v1886_v60 = vld [vmem:[%s2658_s13] ss:$0 sm:$0xff] }
 0x6b3   : > { %1981 = vmatprep.subr.mxu0 %v2213_v32 }
 0x6b7   : > { %v2132_v61 = vpop.eup %2131 }
 0x6b8   : > { %v912_v62 = vmul.f32 %v2132_v61, %v2126_v49  ;;  %v1423_v49 = vrot.slane %v2467_v37, %v1422_v45  ;;  %v2114_v37 = vld [vmem:[%s2364_s14 + $0x20] sm:$0xff]  }
 0x6b9   : > { %2019 = vmatpush3.bf16.msra.mxu1 %v2114_v37 }
 0x6ba   : > { %1974 = vmatmul.mubr.msk.f32.vlgmr.msra.gmra.mxu0 %vm660_vm3, %v912_v62  ;;  %2020 = vmatprep.subr.bf16.mxu1 %v2213_v32 }
 0x6bb   : > { %v2134_v0 = vpop.eup %2133  ;;  %1982 = vmatpush3.msra.mxu0 %v1079_v63  ;;  %1983 = vmatprep.mubr.msk.f32.mxu0 %vm2214_vm2, %v2213_v32 }
 0x6bc   : > { %v1077_v1 = vmul.f32 %v2134_v0, %v2128_v51  ;;  %1991 = vmatprep.subr.mxu0 %v2213_v32 }
 0x6be   : > { %1984 = vmatmul.mubr.msk.f32.vlgmr.msra.gmra.mxu0 %vm660_vm3, %v1077_v1 }
 0x6bf   : > { %1993 = vmatprep.mubr.msk.f32.mxu0 %vm2214_vm2, %v2213_v32 }
 0x6de   : > { %v1240_v2 = vpop.xlane.xlu1 %1239 }
 0x6df   : > { %2135 = vrcp.f32 %v1240_v2 }
 0x6e2   : > { %v1244_v3 = vpop.permute.xlu1 %1243 }
 0x6e3   : > { %1992 = vmatpush3.msra.mxu0 %v1244_v3 }
 0x6e4   : > { %1996 = vmatprep.subr.bf16.mxu0 %v2213_v32 }
 0x6ec   : > { %v2136_v4 = vpop.eup %2135 }
 0x6ed   : > { %v1242_v5 = vmul.f32 %v2136_v4, %v2130_v56  ;;  %v2115_v56 = vld [vmem:[%s2364_s14 + $0x18] sm:$0xff]   ;;  %s1615_s14 = sld [smem:[#allocation5 + %s2197_s30]] (!%p1900_p4) }
 0x6ee   : > { %2021 = vmatpush3.bf16.msra.mxu1 %v2115_v56 }
 0x6ef   : > { %1994 = vmatmul.mubr.msk.f32.vlgmr.msra.gmra.mxu0 %vm660_vm3, %v1242_v5  ;;  %2022 = vmatprep.subr.bf16.mxu1 %v2213_v32 }
 0x6f0   : > { %2000 = vmatprep.mubr.msk.bf16.mxu0 %vm2214_vm2, %v2213_v32  ;;  %1997 = vmatpush3.bf16.msra.mxu0 %v2107_v6 }
 0x6f1   : > { %1998 = vmatprep.subr.bf16.mxu0 %v2213_v32 }
 0x6f2   : > { %2023 = vmatpush3.bf16.msra.mxu1 %v2116_v57 }
 0x6f3   : > { %2024 = vmatprep.subr.bf16.mxu1 %v2213_v32  ;;  %s1616_s18 = scalar_lea.vmem (!%p1900_p4), [#allocation2], %s1615_s14 }
 0x6f4   : > { %1999 = vmatpush3.bf16.msra.mxu0 %v2108_v11 }
 0x6f5   : > { %2004 = vmatprep.subr.bf16.mxu0 %v2213_v32 }
 0x6f6   : > { %2025 = vmatpush3.bf16.msra.mxu1 %v2117_v58 }
 0x6f7   : > { %2026 = vmatprep.subr.bf16.mxu1 %v2213_v32 }
 0x6fa   : > { %2027 = vmatpush3.bf16.msra.mxu1 %v2118_v59 }
 0x77a   : > { %v985_v7 = vpop.f32.mrf.mxu0 }
 0x77b   : > { %1320 = vrot.lane.b32.xlu0 %v985_v7, %s2228_s17 }
 0x77c   : > { %v1975_v8 = vpop.f32.mrf.mxu0 }
 0x77d   : > { %v1899_v8 = vld [vmem:[%s2369_s22 + $0x8] ss:$0 sm:$0xff] }
 0x77e   : > { %v1150_v9 = vpop.f32.mrf.mxu0 }
 0x77f   : > { %1324 = vrot.lane.b32.xlu1 %v1150_v9, %s2229_s23 }
 0x780   : > { %v1985_v10 = vpop.f32.mrf.mxu0 }
 0x7af   : > { %v1315_v12 = vpop.f32.mrf.mxu0 }
 0x7b0   : > { %1328 = vrot.lane.b32.xlu0 %v1315_v12, %s2230_s12 }
 0x7b1   : > { %v1995_v13 = vpop.f32.mrf.mxu0 }
 0x7ed   : > { %v1321_v14 = vpop.permute.xlu0 %1320 }
 0x7ee   : > { %v1331_v16 = vsel %vm660_vm3, %v2513_v25, %v1321_v14 }
 0x7f1   : > { %v1325_v15 = vpop.permute.xlu1 %1324 }
 0x7f2   : > { %v1333_v17 = vsel %vm1332_vm5, %v1331_v16, %v1325_v15 }
 0x822   : > { %v1329_v18 = vpop.permute.xlu0 %1328 }
 0x823   : > { %v1335_v19 = vsel %vm1334_vm6, %v1333_v17, %v1329_v18 }
 0x824   : > { %v1336_v20 = vpack.c.bf16 %v1335_v19, %v1335_v19 }
 0x826   : > { %2001 = vmatmul.mubr.msk.bf16.vlgmr.msra.gmra.mxu0 %vm542_vm1, %v1336_v20 }
 0x827   : > { %2008 = vmatprep.mubr.msk.bf16.mxu0 %vm2214_vm2, %v2213_v32  ;;  %2005 = vmatpush3.bf16.msra.mxu0 %v2109_v39 }
 0x828   : > { %2006 = vmatprep.subr.bf16.mxu0 %v2213_v32 }
 0x8e6   : > { %v1390_v23 = vpop.f32.mrf.mxu0 }
 0x8e7   : > { %v1396_v26 = vadd.f32 %v1390_v23, %v2447_v24  ;;  %v2110_v24 = vld [vmem:[%s2359_s0] sm:$0xff]  }
 0x8e8   : > { %v2002_v27 = vpop.f32.mrf.mxu0  ;;  %2007 = vmatpush3.bf16.msra.mxu0 %v2110_v24 }
 0x8e9   : > { %v2548_v25 = vadd.f32 %v1400_v22, %v1396_v26 }
 0x8ea   : > { %v1393_v28 = vpop.f32.mrf.mxu0 }
 0x8eb   : > { %v1402_v29 = vsel %vm542_vm1, %v2548_v25, 0.0 }
 0x8ec   : > { %1403 = vadd.xlane.f32.xlu1 %v1402_v29  ;;  %v2003_v30 = vpop.f32.mrf.mxu0 }
 0x975   : > { %v1404_v31 = vpop.xlane.xlu1 %1403 }
 0x976   : > { %v1405_v33 = vmul.f32 0.03125, %v1404_v31 }
 0x978   : > { %v1406_v34 = vsub.f32 %v2548_v25, %v1405_v33 }
 0x97a   : > { %v1407_v36 = vmul.f32 %v1406_v34, %v1406_v34 }
 0x97c   : > { %v1408_v38 = vsel %vm542_vm1, %v1407_v36, 0.0 }
 0x97d   : > { %1409 = vadd.xlane.f32.xlu0 %v1408_v38 }
 0xa06   : > { %v1410_v40 = vpop.xlane.xlu0 %1409 }
 0xa07   : > { %v1411_v41 = vmul.f32 0.03125, %v1410_v40 }
 0xa09   : > { %v1412_v43 = vadd.f32 1e-05, %v1411_v41 }
 0xa0b   : > { %2137 = vrsqrt.f32 %v1412_v43 }
 0xa18   : > { %v2138_v47 = vpop.eup %2137 }
 0xa19   : > { %v1414_v48 = vmul.f32 %v2138_v47, %v1406_v34 }
 0xa1b   : > { %v1419_v50 = vmul.f32 %v1418_v46, %v1414_v48 }
 0xa1d   : > { %v1424_v51 = vadd.f32 %v1423_v49, %v1419_v50 }
 0xa1f   : > { %v1425_v52 = vpack.c.bf16 %v1424_v51, %v1424_v51 }
 0xa21   : > { %2009 = vmatmul.mubr.msk.bf16.vlgmr.msra.gmra.mxu0 %vm542_vm1, %v1425_v52 }
 0xae1   : > { %v1485_v61 = vpop.f32.mrf.mxu0 }
 0xae2   : > { %v1486_v62 = vadd.f32 %v1886_v60, %v1485_v61 }
 0xae3   : > { %v2010_v63 = vpop.f32.mrf.mxu0 }
 0xae4   : > { %v1890_v0 = vmul.f32 -1.702, %v1486_v62 }
 0xae5   : > { %v1488_v1 = vpop.f32.mrf.mxu0 }
 0xae6   : > { %v1493_v2 = vmul.f32 1.442695, %v1890_v0 }
 0xae7   : > { %v2011_v3 = vpop.f32.mrf.mxu0 }
 0xae8   : > { %2139 = vpow2.f32 %v1493_v2 }
 0xaf5   : > { %v2140_v4 = vpop.eup %2139 }
 0xaf6   : > { %v1495_v5 = vadd.f32 1.0, %v2140_v4 }
 0xaf8   : > { %2141 = vrcp.f32 %v1495_v5 }
 0xb05   : > { %v2142_v32 = vpop.eup %2141 }
 0xb06   : > { %v1498_v6 = vmul.f32 %v2142_v32, %v1486_v62 }
 0xb08   : > { %v1499_v7 = vpack.c.bf16 %v1498_v6, %v1498_v6 }
 0xb0a   : > { %2029 = vmatmul.mubr.bf16.vlgmr.msra.gmra.mxu1 %v1499_v7 }
 0xbca   : > { %v1598_v9 = vpop.f32.mrf.mxu1 }
 0xbcb   : > { %v1604_v10 = vadd.f32 %v1598_v9, %v2548_v25 }
 0xbcc   : > { %v2030_v11 = vpop.f32.mrf.mxu1  ;;  %1614 = sbr.rel (%p1900_p4) target bundleno = 3535 (0xdcf), region = 68 }
 0xbcd   : > { %v1609_v12 = vadd.f32 %v1899_v8, %v1604_v10 }
 0xbce   : > { %v1601_v13 = vpop.f32.mrf.mxu1 }
 0xbcf   : > { %1610 = vst.msk [vmem:[#allocation2] sm:$0xff] %vm542_vm1, %v1609_v12 }
 0xbd0   : > { %v2031_v14 = vpop.f32.mrf.mxu1 }
 0xbd1   : > { %vm1619_vm7 = vcmask 253952   ;;  %v1641_v22 = vld [vmem:[%s2659_s29 + $0x18] sm:$0xff]  ;;  %v2231_v23 = vmov 0.0   ;;  %v1640_v26 = vld [vmem:[%s2659_s29 + $0x10] sm:$0xff]  ;;  %vm2232_vm8 = vmmov 0   ;;  %v1639_v27 = vld [vmem:[%s2659_s29 + $0x8] sm:$0xff] }
 0xbd2   : > { %2032 = vmatprep.subr.mxu0 %v2231_v23  ;;  %2040 = vmatprep.mubr.msk.f32.mxu0 %vm2232_vm8, %v2231_v23  ;;  %v1638_v25 = vld [vmem:[%s2659_s29] sm:$0xff] }
 0xbd3   : > { %2033 = vmatpush3.msra.mxu0 %v1641_v22  ;;  %v1618_v31 = vld [vmem:[%s2661_s25] sm:$0x3] }
 0xbd4   : > { %2034 = vmatprep.subr.mxu0 %v2231_v23  ;;  %v1635_v36 = vrot.slane %v1618_v31, 1 }
 0xbd5   : > { %2035 = vmatpush3.msra.mxu0 %v1640_v26 }
 0xbd6   : > { %v1617_v15 = vld [vmem:[%s1616_s18] sm:$0x1]  ;;  %2036 = vmatprep.subr.mxu0 %v2231_v23 }
 0xbd7   : > { %v1620_v16 = vsel %vm1619_vm7, %v1617_v15, 0.0  ;;  %2037 = vmatpush3.msra.mxu0 %v1639_v27 }
 0xbd8   : > { %1621 = vadd.xlane.f32.xlu0 %v1620_v16  ;;  %2038 = vmatprep.subr.mxu0 %v2231_v23 }
 0xbd9   : > { %2039 = vmatpush3.msra.mxu0 %v1638_v25 }
 0xc61   : > { %v1622_v17 = vpop.xlane.xlu0 %1621 }
 0xc62   : > { %v1623_v18 = vmul.f32 0.03125, %v1622_v17 }
 0xc64   : > { %v1624_v19 = vsub.f32 %v1617_v15, %v1623_v18 }
 0xc66   : > { %v1625_v20 = vmul.f32 %v1624_v19, %v1624_v19 }
 0xc68   : > { %v1626_v21 = vsel %vm1619_vm7, %v1625_v20, 0.0 }
 0xc69   : > { %1627 = vadd.xlane.f32.xlu0 %v1626_v21 }
 0xcf2   : > { %v1628_v28 = vpop.xlane.xlu0 %1627 }
 0xcf3   : > { %v1629_v29 = vmul.f32 0.03125, %v1628_v28 }
 0xcf5   : > { %v1630_v30 = vadd.f32 1e-05, %v1629_v29 }
 0xcf7   : > { %2143 = vrsqrt.f32 %v1630_v30 }
 0xd04   : > { %v2144_v33 = vpop.eup %2143 }
 0xd05   : > { %v1632_v34 = vmul.f32 %v2144_v33, %v1624_v19 }
 0xd07   : > { %v1633_v38 = vmul.f32 %v1632_v34, %v1618_v31 }
 0xd09   : > { %v1637_v39 = vadd.f32 %v1635_v36, %v1633_v38 }
 0xd0b   : > { %2041 = vmatmul.mubr.msk.f32.vlgmr.msra.gmra.mxu0 %vm542_vm1, %v1637_v39 }
 0xdcb   : > { %v1711_v24 = vpop.f32.mrf.mxu0 }
 0xdcc   : > { %v1718_v40 = vrot.slane %v1711_v24, %v559_v42 }
 0xdcd   : > { %v2042_v41 = vpop.f32.mrf.mxu0 }
 0xdce   : > { %1719 = vst [vmem:[%s2660_s15] sm:$0xff] %v1718_v40 }
 0xdcf PF: > { %s2662_s19 = sld [smem:[#allocation9_spill]] }
 0xdd0   : > { %s2663_s1 = sld [smem:[#allocation7_spill]] }
 0xdd1   : > { %s2664_s30 = sld [smem:[#allocation8_spill]] }
 0xdd2   : > { %s2665_s13 = sld [smem:[#allocation10_spill]] }
 0xdd3   : > { %s2666_s14 = sld [smem:[#allocation11_spill]] }
 0xdd5   : > { %s32_s15 = sadd.s32 1, %s2662_s19  }
 0xdd6   : > { %p29_p5 = scmp.ge.s32.totalorder %s32_s15, 6  }
 0xdd8   :  { %31 = sbr.rel (!%p29_p5) target bundleno = 31 (0x1f), region = 122 }

</bundles_post_ra>
